<compile_context>
chip_gen: v7x
topology: tpu7x:2x2x1
jax: 0.10.0
libtpu: 0.0.40
codegen_flags: <defaults>
</compile_context>

<pallas_src>
import functools
import math

import jax
import jax.numpy as jnp
from jax.experimental import pallas as pl
from jax.experimental.pallas import tpu as pltpu


# ----------------------------- Pallas kernel --------------------------------
def _fused_conv_kernel(x_ref, w_ref, b_ref, o_ref, *, KH, KW, WP):
    """One (batch, OC-tile) step of a stride-1 conv as KH*KW fused matmuls.

    x_ref: (1, R, C)        flattened padded NHWC rows for one batch element
    w_ref: (KH*KW, C, TOC)  per-tap weights, OC padded to a lane-dense tile
    b_ref: (1, TOC)         bias (f32)
    o_ref: (1, M, TOC)      M = OH * WP (padded-width output domain), f32
    """
    M, TOC = o_ref.shape[1], o_ref.shape[2]
    # Init the f32 accumulator (the output VMEM block itself) with the bias.
    o_ref[0] = jnp.broadcast_to(b_ref[...], (M, TOC))
    for i in range(KH):                      # unrolled: KH*KW small MXU dots
        for j in range(KW):
            off = i * WP + j
            win = x_ref[0, off:off + M, :]   # (M, C) contiguous slab, no reshape
            o_ref[0] += jnp.dot(win, w_ref[i * KW + j],
                                preferred_element_type=jnp.float32)


# --------------------------- parameter preparation ---------------------------
def prepare_conv_params(weight, bias, *, compute_dtype=jnp.bfloat16, lane=128):
    """(OC, C, KH, KW) -> (KH*KW, C, OCp) taps with OC padded to 128 lanes.

    Call once per parameter set (not per forward) to avoid re-materializing
    the transposed weight every call.
    """
    OC, C, KH, KW = weight.shape
    OCp = ((OC + lane - 1) // lane) * lane
    w = jnp.transpose(weight, (2, 3, 1, 0)).reshape(KH * KW, C, OC)
    w = jnp.pad(w, ((0, 0), (0, 0), (0, OCp - OC))).astype(compute_dtype)
    if bias is None:
        b = jnp.zeros((1, OCp), jnp.float32)
    else:
        b = jnp.pad(bias.astype(jnp.float32), (0, OCp - OC)).reshape(1, OCp)
    return w, b


# ------------------------------ conv forward ---------------------------------
def conv2d_list_forward(x, weight, bias, *, stride=1, padding=0,
                        compute_dtype=jnp.bfloat16):
    """Matches Conv2dList.forward: F.conv2d(x, cat(weight), bias, stride, padding)."""
    N, C, H, W = x.shape
    OC, _, KH, KW = weight.shape
    w_k, b_k = prepare_conv_params(weight, bias, compute_dtype=compute_dtype)
    OCp = w_k.shape[-1]

    HP, WP = H + 2 * padding, W + 2 * padding
    OH1, OW1 = HP - KH + 1, WP - KW + 1      # stride-1 output extent
    M = OH1 * WP                              # padded-width output rows
    R = (HP + 1) * WP                         # +1 zero row: slab-read safety

    # Glue: single pad + NCHW->NHWC transpose of the (small) input; no
    # KH*KW-inflated patch matrix is ever materialized in HBM.
    xp = jnp.pad(x, ((0, 0), (0, 0), (padding, padding + 1), (padding, padding)))
    x_flat = jnp.transpose(xp, (0, 2, 3, 1)).astype(compute_dtype).reshape(N, R, C)

    TOC = 256 if OCp % 256 == 0 else 128      # lane-dense OC tile
    kernel = functools.partial(_fused_conv_kernel, KH=KH, KW=KW, WP=WP)

    # TODO(synk): for images whose padded NHWC slab exceeds VMEM, add an OH
    # grid axis with overlapping (Element-indexed) input row blocks.
    out = pl.pallas_call(
        kernel,
        out_shape=jax.ShapeDtypeStruct((N, M, OCp), jnp.float32),
        grid_spec=pltpu.PrefetchScalarGridSpec(
            num_scalar_prefetch=0,
            grid=(N, OCp // TOC),
            in_specs=[
                # whole padded image of batch n; stays resident across OC tiles
                pl.BlockSpec((1, R, C), lambda n, t: (n, 0, 0)),
                pl.BlockSpec((KH * KW, C, TOC), lambda n, t: (0, 0, t)),
                pl.BlockSpec((1, TOC), lambda n, t: (0, t)),
            ],
            out_specs=pl.BlockSpec((1, M, TOC), lambda n, t: (n, 0, t)),
        ),
        compiler_params=pltpu.CompilerParams(
            dimension_semantics=("parallel", "parallel"),   # v7x megacore
            vmem_limit_bytes=48 * 1024 * 1024,              # headroom on v7x
        ),
    )(x_flat, w_k, b_k)

    # Glue: drop padded width / padded OC, back to NCHW to match F.conv2d.
    out = out.reshape(N, OH1, WP, OCp)[:, :, :OW1, :OC]
    if stride != 1:
        # TODO(synk): stride>1 subsamples the stride-1 result; a dedicated
        # strided kernel would avoid the discarded compute.
        out = out[:, ::stride, ::stride, :]
    return jnp.transpose(out, (0, 3, 1, 2))


# ----------------------------- parameter init --------------------------------
def init_params(key, in_channels, out_channels, kernel_size):
    """Match torch defaults: kaiming_uniform_(a=sqrt(5)) and bias ~
    U(-1/sqrt(fan_in), 1/sqrt(fan_in))."""
    fan_in = in_channels * kernel_size * kernel_size
    bound = 1.0 / math.sqrt(fan_in)
    kw, kb = jax.random.split(key)
    weight = jax.random.uniform(
        kw, (out_channels, in_channels, kernel_size, kernel_size),
        minval=-bound, maxval=bound, dtype=jnp.float32)
    bias = jax.random.uniform(
        kb, (out_channels,), minval=-bound, maxval=bound, dtype=jnp.float32)
    return weight, bias


if __name__ == "__main__":
    # Small shapes consistent with the module's forward (NCHW conv).
    N, C, H, W = 2, 4, 16, 16
    OC, KS = 8, 3
    stride, padding = 1, 1

    key = jax.random.PRNGKey(0)
    kx, kp = jax.random.split(key)
    x = jax.random.normal(kx, (N, C, H, W), dtype=jnp.float32)
    weight, bias = init_params(kp, C, OC, KS)

    fwd = jax.jit(functools.partial(conv2d_list_forward,
                                    stride=stride, padding=padding))
    y = fwd(x, weight, bias)
    y = jax.block_until_ready(y)

    # Reference: XLA conv on bf16-rounded inputs (the kernel's MXU dots run in
    # bf16 with f32 accumulation; the bias add is f32).
    xr = x.astype(jnp.bfloat16).astype(jnp.float32)
    wr = weight.astype(jnp.bfloat16).astype(jnp.float32)
    y_ref = jax.lax.conv_general_dilated(
        xr, wr, window_strides=(stride, stride),
        padding=[(padding, padding), (padding, padding)],
        dimension_numbers=("NCHW", "OIHW", "NCHW")) + bias.reshape(1, OC, 1, 1)

    assert y.shape == (N, OC, H, W), y.shape
    err = float(jnp.max(jnp.abs(y - y_ref)))
    assert err < 2e-3, f"max abs err {err}"

    print("KERNEL_OK")
</pallas_src>

<mosaic_0001>
module attributes {stable_mosaic.version = 11 : i64} {
  func.func @_fused_conv_kernel(%arg0: i32, %arg1: i32, %arg2: memref<1x342x4xbf16, #tpu.memory_space<vmem>>, %arg3: memref<9x4x128xbf16, #tpu.memory_space<vmem>>, %arg4: memref<1x128xf32, #tpu.memory_space<vmem>>, %arg5: memref<1x288x128xf32, #tpu.memory_space<vmem>>) attributes {dimension_semantics = [#tpu.dimension_semantics<parallel>, #tpu.dimension_semantics<parallel>], iteration_bounds = array<i64: 2, 1>, scalar_prefetch = 0 : i64, scratch_operands = 0 : i64, tpu.core_type = #tpu.core_type<tc>, window_params = [{transform_indices = @transform_0, window_bounds = array<i64: 1, 342, 4>}, {transform_indices = @transform_1, window_bounds = array<i64: 9, 4, 128>}, {transform_indices = @transform_2, window_bounds = array<i64: 1, 128>}, {transform_indices = @transform_3, window_bounds = array<i64: 1, 288, 128>}]} {
    %c0 = arith.constant 0 : index
    %c0_0 = arith.constant 0 : index
    %0 = vector.load %arg4[%c0, %c0_0] : memref<1x128xf32, #tpu.memory_space<vmem>>, vector<1x128xf32>
    %1 = vector.shape_cast %0 : vector<1x128xf32> to vector<1x128xf32>
    %2 = vector.broadcast %1 : vector<1x128xf32> to vector<288x128xf32>
    %c0_1 = arith.constant 0 : index
    %c0_2 = arith.constant 0 : index
    %c0_3 = arith.constant 0 : index
    %3 = vector.load %arg5[%c0_1, %c0_2, %c0_3] : memref<1x288x128xf32, #tpu.memory_space<vmem>>, vector<1x288x128xf32>
    %4 = vector.shape_cast %3 : vector<1x288x128xf32> to vector<288x128xf32>
    %5 = vector.shape_cast %2 : vector<288x128xf32> to vector<1x288x128xf32>
    tpu.vector_store %arg5[%c0_1, %c0_2, %c0_3], %5 {strides = array<i32>} : memref<1x288x128xf32, #tpu.memory_space<vmem>>, vector<1x288x128xf32>,
    %c0_4 = arith.constant 0 : index
    %c0_5 = arith.constant 0 : index
    %c0_6 = arith.constant 0 : index
    %6 = vector.load %arg2[%c0_4, %c0_5, %c0_6] : memref<1x342x4xbf16, #tpu.memory_space<vmem>>, vector<1x288x4xbf16>
    %7 = vector.shape_cast %6 : vector<1x288x4xbf16> to vector<288x4xbf16>
    %c0_7 = arith.constant 0 : index
    %c0_8 = arith.constant 0 : index
    %c0_9 = arith.constant 0 : index
    %8 = vector.load %arg5[%c0_7, %c0_8, %c0_9] : memref<1x288x128xf32, #tpu.memory_space<vmem>>, vector<1x288x128xf32>
    %9 = vector.shape_cast %8 : vector<1x288x128xf32> to vector<288x128xf32>
    %c0_10 = arith.constant 0 : index
    %c0_11 = arith.constant 0 : index
    %c0_12 = arith.constant 0 : index
    %10 = vector.load %arg3[%c0_10, %c0_11, %c0_12] : memref<9x4x128xbf16, #tpu.memory_space<vmem>>, vector<1x4x128xbf16>
    %11 = vector.shape_cast %10 : vector<1x4x128xbf16> to vector<4x128xbf16>
    %cst = arith.constant dense<0.000000e+00> : vector<288x128xf32>
    %12 = tpu.matmul %7, %11, %cst {dimension_numbers = #tpu.dot_dimension_numbers<[1], [0], [0], [1], [0, 0, 1, 1], [], []>} : vector<288x4xbf16>, vector<4x128xbf16>, vector<288x128xf32> -> vector<288x128xf32>
    %13 = arith.addf %9, %12 : vector<288x128xf32>
    %c0_13 = arith.constant 0 : index
    %c0_14 = arith.constant 0 : index
    %c0_15 = arith.constant 0 : index
    %14 = vector.load %arg5[%c0_13, %c0_14, %c0_15] : memref<1x288x128xf32, #tpu.memory_space<vmem>>, vector<1x288x128xf32>
    %15 = vector.shape_cast %14 : vector<1x288x128xf32> to vector<288x128xf32>
    %16 = vector.shape_cast %13 : vector<288x128xf32> to vector<1x288x128xf32>
    tpu.vector_store %arg5[%c0_13, %c0_14, %c0_15], %16 {strides = array<i32>} : memref<1x288x128xf32, #tpu.memory_space<vmem>>, vector<1x288x128xf32>,
    %c0_16 = arith.constant 0 : index
    %c1 = arith.constant 1 : index
    %c0_17 = arith.constant 0 : index
    %17 = vector.load %arg2[%c0_16, %c1, %c0_17] : memref<1x342x4xbf16, #tpu.memory_space<vmem>>, vector<1x288x4xbf16>
    %18 = vector.shape_cast %17 : vector<1x288x4xbf16> to vector<288x4xbf16>
    %c0_18 = arith.constant 0 : index
    %c0_19 = arith.constant 0 : index
    %c0_20 = arith.constant 0 : index
    %19 = vector.load %arg5[%c0_18, %c0_19, %c0_20] : memref<1x288x128xf32, #tpu.memory_space<vmem>>, vector<1x288x128xf32>
    %20 = vector.shape_cast %19 : vector<1x288x128xf32> to vector<288x128xf32>
    %c1_21 = arith.constant 1 : index
    %c0_22 = arith.constant 0 : index
    %c0_23 = arith.constant 0 : index
    %21 = vector.load %arg3[%c1_21, %c0_22, %c0_23] : memref<9x4x128xbf16, #tpu.memory_space<vmem>>, vector<1x4x128xbf16>
    %22 = vector.shape_cast %21 : vector<1x4x128xbf16> to vector<4x128xbf16>
    %cst_24 = arith.constant dense<0.000000e+00> : vector<288x128xf32>
    %23 = tpu.matmul %18, %22, %cst_24 {dimension_numbers = #tpu.dot_dimension_numbers<[1], [0], [0], [1], [0, 0, 1, 1], [], []>} : vector<288x4xbf16>, vector<4x128xbf16>, vector<288x128xf32> -> vector<288x128xf32>
    %24 = arith.addf %20, %23 : vector<288x128xf32>
    %c0_25 = arith.constant 0 : index
    %c0_26 = arith.constant 0 : index
    %c0_27 = arith.constant 0 : index
    %25 = vector.load %arg5[%c0_25, %c0_26, %c0_27] : memref<1x288x128xf32, #tpu.memory_space<vmem>>, vector<1x288x128xf32>
    %26 = vector.shape_cast %25 : vector<1x288x128xf32> to vector<288x128xf32>
    %27 = vector.shape_cast %24 : vector<288x128xf32> to vector<1x288x128xf32>
    tpu.vector_store %arg5[%c0_25, %c0_26, %c0_27], %27 {strides = array<i32>} : memref<1x288x128xf32, #tpu.memory_space<vmem>>, vector<1x288x128xf32>,
    %c0_28 = arith.constant 0 : index
    %c2 = arith.constant 2 : index
    %c0_29 = arith.constant 0 : index
    %28 = vector.load %arg2[%c0_28, %c2, %c0_29] : memref<1x342x4xbf16, #tpu.memory_space<vmem>>, vector<1x288x4xbf16>
    %29 = vector.shape_cast %28 : vector<1x288x4xbf16> to vector<288x4xbf16>
    %c0_30 = arith.constant 0 : index
    %c0_31 = arith.constant 0 : index
    %c0_32 = arith.constant 0 : index
    %30 = vector.load %arg5[%c0_30, %c0_31, %c0_32] : memref<1x288x128xf32, #tpu.memory_space<vmem>>, vector<1x288x128xf32>
    %31 = vector.shape_cast %30 : vector<1x288x128xf32> to vector<288x128xf32>
    %c2_33 = arith.constant 2 : index
    %c0_34 = arith.constant 0 : index
    %c0_35 = arith.constant 0 : index
    %32 = vector.load %arg3[%c2_33, %c0_34, %c0_35] : memref<9x4x128xbf16, #tpu.memory_space<vmem>>, vector<1x4x128xbf16>
    %33 = vector.shape_cast %32 : vector<1x4x128xbf16> to vector<4x128xbf16>
    %cst_36 = arith.constant dense<0.000000e+00> : vector<288x128xf32>
    %34 = tpu.matmul %29, %33, %cst_36 {dimension_numbers = #tpu.dot_dimension_numbers<[1], [0], [0], [1], [0, 0, 1, 1], [], []>} : vector<288x4xbf16>, vector<4x128xbf16>, vector<288x128xf32> -> vector<288x128xf32>
    %35 = arith.addf %31, %34 : vector<288x128xf32>
    %c0_37 = arith.constant 0 : index
    %c0_38 = arith.constant 0 : index
    %c0_39 = arith.constant 0 : index
    %36 = vector.load %arg5[%c0_37, %c0_38, %c0_39] : memref<1x288x128xf32, #tpu.memory_space<vmem>>, vector<1x288x128xf32>
    %37 = vector.shape_cast %36 : vector<1x288x128xf32> to vector<288x128xf32>
    %38 = vector.shape_cast %35 : vector<288x128xf32> to vector<1x288x128xf32>
    tpu.vector_store %arg5[%c0_37, %c0_38, %c0_39], %38 {strides = array<i32>} : memref<1x288x128xf32, #tpu.memory_space<vmem>>, vector<1x288x128xf32>,
    %c0_40 = arith.constant 0 : index
    %c18 = arith.constant 18 : index
    %c0_41 = arith.constant 0 : index
    %39 = vector.load %arg2[%c0_40, %c18, %c0_41] : memref<1x342x4xbf16, #tpu.memory_space<vmem>>, vector<1x288x4xbf16>
    %40 = vector.shape_cast %39 : vector<1x288x4xbf16> to vector<288x4xbf16>
    %c0_42 = arith.constant 0 : index
    %c0_43 = arith.constant 0 : index
    %c0_44 = arith.constant 0 : index
    %41 = vector.load %arg5[%c0_42, %c0_43, %c0_44] : memref<1x288x128xf32, #tpu.memory_space<vmem>>, vector<1x288x128xf32>
    %42 = vector.shape_cast %41 : vector<1x288x128xf32> to vector<288x128xf32>
    %c3 = arith.constant 3 : index
    %c0_45 = arith.constant 0 : index
    %c0_46 = arith.constant 0 : index
    %43 = vector.load %arg3[%c3, %c0_45, %c0_46] : memref<9x4x128xbf16, #tpu.memory_space<vmem>>, vector<1x4x128xbf16>
    %44 = vector.shape_cast %43 : vector<1x4x128xbf16> to vector<4x128xbf16>
    %cst_47 = arith.constant dense<0.000000e+00> : vector<288x128xf32>
    %45 = tpu.matmul %40, %44, %cst_47 {dimension_numbers = #tpu.dot_dimension_numbers<[1], [0], [0], [1], [0, 0, 1, 1], [], []>} : vector<288x4xbf16>, vector<4x128xbf16>, vector<288x128xf32> -> vector<288x128xf32>
    %46 = arith.addf %42, %45 : vector<288x128xf32>
    %c0_48 = arith.constant 0 : index
    %c0_49 = arith.constant 0 : index
    %c0_50 = arith.constant 0 : index
    %47 = vector.load %arg5[%c0_48, %c0_49, %c0_50] : memref<1x288x128xf32, #tpu.memory_space<vmem>>, vector<1x288x128xf32>
    %48 = vector.shape_cast %47 : vector<1x288x128xf32> to vector<288x128xf32>
    %49 = vector.shape_cast %46 : vector<288x128xf32> to vector<1x288x128xf32>
    tpu.vector_store %arg5[%c0_48, %c0_49, %c0_50], %49 {strides = array<i32>} : memref<1x288x128xf32, #tpu.memory_space<vmem>>, vector<1x288x128xf32>,
    %c0_51 = arith.constant 0 : index
    %c19 = arith.constant 19 : index
    %c0_52 = arith.constant 0 : index
    %50 = vector.load %arg2[%c0_51, %c19, %c0_52] : memref<1x342x4xbf16, #tpu.memory_space<vmem>>, vector<1x288x4xbf16>
    %51 = vector.shape_cast %50 : vector<1x288x4xbf16> to vector<288x4xbf16>
    %c0_53 = arith.constant 0 : index
    %c0_54 = arith.constant 0 : index
    %c0_55 = arith.constant 0 : index
    %52 = vector.load %arg5[%c0_53, %c0_54, %c0_55] : memref<1x288x128xf32, #tpu.memory_space<vmem>>, vector<1x288x128xf32>
    %53 = vector.shape_cast %52 : vector<1x288x128xf32> to vector<288x128xf32>
    %c4 = arith.constant 4 : index
    %c0_56 = arith.constant 0 : index
    %c0_57 = arith.constant 0 : index
    %54 = vector.load %arg3[%c4, %c0_56, %c0_57] : memref<9x4x128xbf16, #tpu.memory_space<vmem>>, vector<1x4x128xbf16>
    %55 = vector.shape_cast %54 : vector<1x4x128xbf16> to vector<4x128xbf16>
    %cst_58 = arith.constant dense<0.000000e+00> : vector<288x128xf32>
    %56 = tpu.matmul %51, %55, %cst_58 {dimension_numbers = #tpu.dot_dimension_numbers<[1], [0], [0], [1], [0, 0, 1, 1], [], []>} : vector<288x4xbf16>, vector<4x128xbf16>, vector<288x128xf32> -> vector<288x128xf32>
    %57 = arith.addf %53, %56 : vector<288x128xf32>
    %c0_59 = arith.constant 0 : index
    %c0_60 = arith.constant 0 : index
    %c0_61 = arith.constant 0 : index
    %58 = vector.load %arg5[%c0_59, %c0_60, %c0_61] : memref<1x288x128xf32, #tpu.memory_space<vmem>>, vector<1x288x128xf32>
    %59 = vector.shape_cast %58 : vector<1x288x128xf32> to vector<288x128xf32>
    %60 = vector.shape_cast %57 : vector<288x128xf32> to vector<1x288x128xf32>
    tpu.vector_store %arg5[%c0_59, %c0_60, %c0_61], %60 {strides = array<i32>} : memref<1x288x128xf32, #tpu.memory_space<vmem>>, vector<1x288x128xf32>,
    %c0_62 = arith.constant 0 : index
    %c20 = arith.constant 20 : index
    %c0_63 = arith.constant 0 : index
    %61 = vector.load %arg2[%c0_62, %c20, %c0_63] : memref<1x342x4xbf16, #tpu.memory_space<vmem>>, vector<1x288x4xbf16>
    %62 = vector.shape_cast %61 : vector<1x288x4xbf16> to vector<288x4xbf16>
    %c0_64 = arith.constant 0 : index
    %c0_65 = arith.constant 0 : index
    %c0_66 = arith.constant 0 : index
    %63 = vector.load %arg5[%c0_64, %c0_65, %c0_66] : memref<1x288x128xf32, #tpu.memory_space<vmem>>, vector<1x288x128xf32>
    %64 = vector.shape_cast %63 : vector<1x288x128xf32> to vector<288x128xf32>
    %c5 = arith.constant 5 : index
    %c0_67 = arith.constant 0 : index
    %c0_68 = arith.constant 0 : index
    %65 = vector.load %arg3[%c5, %c0_67, %c0_68] : memref<9x4x128xbf16, #tpu.memory_space<vmem>>, vector<1x4x128xbf16>
    %66 = vector.shape_cast %65 : vector<1x4x128xbf16> to vector<4x128xbf16>
    %cst_69 = arith.constant dense<0.000000e+00> : vector<288x128xf32>
    %67 = tpu.matmul %62, %66, %cst_69 {dimension_numbers = #tpu.dot_dimension_numbers<[1], [0], [0], [1], [0, 0, 1, 1], [], []>} : vector<288x4xbf16>, vector<4x128xbf16>, vector<288x128xf32> -> vector<288x128xf32>
    %68 = arith.addf %64, %67 : vector<288x128xf32>
    %c0_70 = arith.constant 0 : index
    %c0_71 = arith.constant 0 : index
    %c0_72 = arith.constant 0 : index
    %69 = vector.load %arg5[%c0_70, %c0_71, %c0_72] : memref<1x288x128xf32, #tpu.memory_space<vmem>>, vector<1x288x128xf32>
    %70 = vector.shape_cast %69 : vector<1x288x128xf32> to vector<288x128xf32>
    %71 = vector.shape_cast %68 : vector<288x128xf32> to vector<1x288x128xf32>
    tpu.vector_store %arg5[%c0_70, %c0_71, %c0_72], %71 {strides = array<i32>} : memref<1x288x128xf32, #tpu.memory_space<vmem>>, vector<1x288x128xf32>,
    %c0_73 = arith.constant 0 : index
    %c36 = arith.constant 36 : index
    %c0_74 = arith.constant 0 : index
    %72 = vector.load %arg2[%c0_73, %c36, %c0_74] : memref<1x342x4xbf16, #tpu.memory_space<vmem>>, vector<1x288x4xbf16>
    %73 = vector.shape_cast %72 : vector<1x288x4xbf16> to vector<288x4xbf16>
    %c0_75 = arith.constant 0 : index
    %c0_76 = arith.constant 0 : index
    %c0_77 = arith.constant 0 : index
    %74 = vector.load %arg5[%c0_75, %c0_76, %c0_77] : memref<1x288x128xf32, #tpu.memory_space<vmem>>, vector<1x288x128xf32>
    %75 = vector.shape_cast %74 : vector<1x288x128xf32> to vector<288x128xf32>
    %c6 = arith.constant 6 : index
    %c0_78 = arith.constant 0 : index
    %c0_79 = arith.constant 0 : index
    %76 = vector.load %arg3[%c6, %c0_78, %c0_79] : memref<9x4x128xbf16, #tpu.memory_space<vmem>>, vector<1x4x128xbf16>
    %77 = vector.shape_cast %76 : vector<1x4x128xbf16> to vector<4x128xbf16>
    %cst_80 = arith.constant dense<0.000000e+00> : vector<288x128xf32>
    %78 = tpu.matmul %73, %77, %cst_80 {dimension_numbers = #tpu.dot_dimension_numbers<[1], [0], [0], [1], [0, 0, 1, 1], [], []>} : vector<288x4xbf16>, vector<4x128xbf16>, vector<288x128xf32> -> vector<288x128xf32>
    %79 = arith.addf %75, %78 : vector<288x128xf32>
    %c0_81 = arith.constant 0 : index
    %c0_82 = arith.constant 0 : index
    %c0_83 = arith.constant 0 : index
    %80 = vector.load %arg5[%c0_81, %c0_82, %c0_83] : memref<1x288x128xf32, #tpu.memory_space<vmem>>, vector<1x288x128xf32>
    %81 = vector.shape_cast %80 : vector<1x288x128xf32> to vector<288x128xf32>
    %82 = vector.shape_cast %79 : vector<288x128xf32> to vector<1x288x128xf32>
    tpu.vector_store %arg5[%c0_81, %c0_82, %c0_83], %82 {strides = array<i32>} : memref<1x288x128xf32, #tpu.memory_space<vmem>>, vector<1x288x128xf32>,
    %c0_84 = arith.constant 0 : index
    %c37 = arith.constant 37 : index
    %c0_85 = arith.constant 0 : index
    %83 = vector.load %arg2[%c0_84, %c37, %c0_85] : memref<1x342x4xbf16, #tpu.memory_space<vmem>>, vector<1x288x4xbf16>
    %84 = vector.shape_cast %83 : vector<1x288x4xbf16> to vector<288x4xbf16>
    %c0_86 = arith.constant 0 : index
    %c0_87 = arith.constant 0 : index
    %c0_88 = arith.constant 0 : index
    %85 = vector.load %arg5[%c0_86, %c0_87, %c0_88] : memref<1x288x128xf32, #tpu.memory_space<vmem>>, vector<1x288x128xf32>
    %86 = vector.shape_cast %85 : vector<1x288x128xf32> to vector<288x128xf32>
    %c7 = arith.constant 7 : index
    %c0_89 = arith.constant 0 : index
    %c0_90 = arith.constant 0 : index
    %87 = vector.load %arg3[%c7, %c0_89, %c0_90] : memref<9x4x128xbf16, #tpu.memory_space<vmem>>, vector<1x4x128xbf16>
    %88 = vector.shape_cast %87 : vector<1x4x128xbf16> to vector<4x128xbf16>
    %cst_91 = arith.constant dense<0.000000e+00> : vector<288x128xf32>
    %89 = tpu.matmul %84, %88, %cst_91 {dimension_numbers = #tpu.dot_dimension_numbers<[1], [0], [0], [1], [0, 0, 1, 1], [], []>} : vector<288x4xbf16>, vector<4x128xbf16>, vector<288x128xf32> -> vector<288x128xf32>
    %90 = arith.addf %86, %89 : vector<288x128xf32>
    %c0_92 = arith.constant 0 : index
    %c0_93 = arith.constant 0 : index
    %c0_94 = arith.constant 0 : index
    %91 = vector.load %arg5[%c0_92, %c0_93, %c0_94] : memref<1x288x128xf32, #tpu.memory_space<vmem>>, vector<1x288x128xf32>
    %92 = vector.shape_cast %91 : vector<1x288x128xf32> to vector<288x128xf32>
    %93 = vector.shape_cast %90 : vector<288x128xf32> to vector<1x288x128xf32>
    tpu.vector_store %arg5[%c0_92, %c0_93, %c0_94], %93 {strides = array<i32>} : memref<1x288x128xf32, #tpu.memory_space<vmem>>, vector<1x288x128xf32>,
    %c0_95 = arith.constant 0 : index
    %c38 = arith.constant 38 : index
    %c0_96 = arith.constant 0 : index
    %94 = vector.load %arg2[%c0_95, %c38, %c0_96] : memref<1x342x4xbf16, #tpu.memory_space<vmem>>, vector<1x288x4xbf16>
    %95 = vector.shape_cast %94 : vector<1x288x4xbf16> to vector<288x4xbf16>
    %c0_97 = arith.constant 0 : index
    %c0_98 = arith.constant 0 : index
    %c0_99 = arith.constant 0 : index
    %96 = vector.load %arg5[%c0_97, %c0_98, %c0_99] : memref<1x288x128xf32, #tpu.memory_space<vmem>>, vector<1x288x128xf32>
    %97 = vector.shape_cast %96 : vector<1x288x128xf32> to vector<288x128xf32>
    %c8 = arith.constant 8 : index
    %c0_100 = arith.constant 0 : index
    %c0_101 = arith.constant 0 : index
    %98 = vector.load %arg3[%c8, %c0_100, %c0_101] : memref<9x4x128xbf16, #tpu.memory_space<vmem>>, vector<1x4x128xbf16>
    %99 = vector.shape_cast %98 : vector<1x4x128xbf16> to vector<4x128xbf16>
    %cst_102 = arith.constant dense<0.000000e+00> : vector<288x128xf32>
    %100 = tpu.matmul %95, %99, %cst_102 {dimension_numbers = #tpu.dot_dimension_numbers<[1], [0], [0], [1], [0, 0, 1, 1], [], []>} : vector<288x4xbf16>, vector<4x128xbf16>, vector<288x128xf32> -> vector<288x128xf32>
    %101 = arith.addf %97, %100 : vector<288x128xf32>
    %c0_103 = arith.constant 0 : index
    %c0_104 = arith.constant 0 : index
    %c0_105 = arith.constant 0 : index
    %102 = vector.load %arg5[%c0_103, %c0_104, %c0_105] : memref<1x288x128xf32, #tpu.memory_space<vmem>>, vector<1x288x128xf32>
    %103 = vector.shape_cast %102 : vector<1x288x128xf32> to vector<288x128xf32>
    %104 = vector.shape_cast %101 : vector<288x128xf32> to vector<1x288x128xf32>
    tpu.vector_store %arg5[%c0_103, %c0_104, %c0_105], %104 {strides = array<i32>} : memref<1x288x128xf32, #tpu.memory_space<vmem>>, vector<1x288x128xf32>,
    return
  }
  func.func @transform_0(%arg0: i32, %arg1: i32) -> (i32, i32, i32) {
    %c0_i32 = arith.constant 0 : i32
    %c0_i32_0 = arith.constant 0 : i32
    %c0_i32_1 = arith.constant 0 : i32
    return %arg0, %c0_i32, %c0_i32_0 : i32, i32, i32
  }
  func.func @transform_1(%arg0: i32, %arg1: i32) -> (i32, i32, i32) {
    %c0_i32 = arith.constant 0 : i32
    %c0_i32_0 = arith.constant 0 : i32
    %c0_i32_1 = arith.constant 0 : i32
    return %c0_i32, %c0_i32_0, %arg1 : i32, i32, i32
  }
  func.func @transform_2(%arg0: i32, %arg1: i32) -> (i32, i32) {
    %c0_i32 = arith.constant 0 : i32
    %c0_i32_0 = arith.constant 0 : i32
    return %c0_i32, %arg1 : i32, i32
  }
  func.func @transform_3(%arg0: i32, %arg1: i32) -> (i32, i32, i32) {
    %c0_i32 = arith.constant 0 : i32
    %c0_i32_0 = arith.constant 0 : i32
    return %arg0, %c0_i32, %arg1 : i32, i32, i32
  }
}

</mosaic_0001>

<bundles_post_ra>
// kernel: conv2d_list_forward.1
= control target key start
LH: loop header
LB: loop body
LE: loop exit
PB: predicated region body
PF: predicated region fallthrough
CT: control target
= control target key end

     0   :  { %s6899_s12 = smov 0   ;;  %s6901_s13 = smov 0   ;;  %s7591_s0 = inlined_call_operand.vmem [shape: bf16[2,342,4], index: 0, kind: input, shape index: {}]   ;;  %s7592_s1 = inlined_call_operand.vmem [shape: bf16[9,4,128], index: 1, kind: input, shape index: {}]   ;;  %s7593_s2 = inlined_call_operand.vmem [shape: f32[1,128], index: 2, kind: input, shape index: {}]   ;;  %s7594_s3 = inlined_call_operand.vmem [shape: f32[2,288,128], index: 3, kind: output, shape index: {}]  }
   0x1   :  { %s6903_s14 = smov 0  }
   0x2 LB: > { %s25_s15 = sadd.s32 1, %s6873_s13  ;;  %p5319_p0 = scmp.ge.s32.totalorder %s6877_s14, 1  ;;  %s6877_s14 = sphi %s6903_s14, %s13_s14   ;;  %s6873_s13 = sphi %s6901_s13, %s7596_s13   ;;  %s6869_s12 = sphi %s6899_s12, %s7595_s12  }
   0x3   : > { %p27_p1 = scmp.ge.s32.totalorder %s25_s15, 2  ;;  %p168_p2 = scmp.lt.s32.totalorder %s6877_s14, 3 }
   0x5   : > { %s7598_s15 = smov (%p27_p1, %s25_s15), 0  ;;  %p169_p3 = pnand %p5319_p0, %p168_p2 }
   0x6   : > { %v338_v0 = vld [vmem:[%s7592_s1] sm:$0x3] (!%p169_p3)  ;;  %vm484_vm0 = vcmask (!%p169_p3), 1041408   ;;  %p202_p4 = scmp.lt.s32.totalorder (!%p169_p3), %s6869_s12, 1  ;;  %v5473_v2 = vld [vmem:[%s7592_s1 + $0x8] sm:$0x3] (!%p169_p3) }
   0x7   : > { %172 = sbr.rel (%p169_p3) target bundleno = 566 (0x236), region = 32  ;;  %6648 = vmatprep.subr.msk.bf16.mxu1 (!%p169_p3), %vm484_vm0, %v338_v0  ;;  %v486_v1 = vsel (!%p169_p3), %vm484_vm0, %v338_v0, 0  ;;  %v5359_v3 = vld [vmem:[%s7592_s1 + $0x2] sm:$0x3] (!%p169_p3)  ;;  %6652 = vmatprep.subr.msk.bf16.mxu0 (!%p169_p3), %vm484_vm0, %v5473_v2  ;;  %v6932_v4 = vsel (!%p169_p3), %vm484_vm0, %v5473_v2, 0  ;;  %vm429_vm1 = vcmask (!%p169_p3), 31744  }
   0x8   : > { %5837 = vmatpush3.bf16.msra.mxu1 (!%p169_p3), %v486_v1  ;;  %5989 = vmatpush3.bf16.msra.mxu0 (!%p169_p3), %v6932_v4  ;;  %v5511_v5 = vld [vmem:[%s7592_s1 + $0xa] sm:$0x3] (!%p169_p3)  ;;  %vm2551_vm2 = vsmask.f32 (!%p169_p3), 6400  ;;  %v6950_v7 = vld [vmem:[%s7592_s1 + $0x4] sm:$0x3] (!%p169_p3) }
   0x9   : > { %6649 = vmatprep.subr.msk.bf16.mxu1 (!%p169_p3), %vm484_vm0, %v5359_v3  ;;  %6654 = vmatprep.subr.msk.bf16.mxu0 (!%p169_p3), %vm484_vm0, %v5511_v5  ;;  %v1109_v9 = vsel (!%p169_p3), %vm484_vm0, %v5359_v3, 0  ;;  %v3289_v18 = vsel (!%p169_p3), %vm484_vm0, %v5511_v5, 0  ;;  %v6975_v40 = vld [vmem:[%s7592_s1 + $0xc] sm:$0x3] (!%p169_p3)  ;;  %vm3196_vm3 = vcmask (!%p169_p3), 1045504   ;;  %vm1528_vm5 = vcmask (!%p169_p3), 1046528  }
   0xa   : > { %vm905_vm4 = vsmask.f32 (!%p169_p3), 7424  ;;  %vm4219_vm6 = vsmask.f32 (!%p169_p3), 5376  ;;  %vm4864_vm7 = vcmask (!%p169_p3), 1044480  }
   0xe   : > { %s7600_s12 = smov (!%p202_p4, %s6869_s12), 1 }
   0xf   : > { %s6658_s24 = smul.u32 172, %s7600_s12 }
  0x10   : > { %s6659_s17 = smul.u32 288, %s7600_s12 }
  0x11   : > { %s6944_s27 = scalar_lea.vmem %s7591_s0, %s6658_s24 }
  0x12   : > { %v6684_v6 = vld [vmem:[%s6944_s27] sm:$0xff]   ;;  %v6685_v8 = vld [vmem:[%s6944_s27 + $0x8] sm:$0xff]   ;;  %v6687_v11 = vld [vmem:[%s6944_s27 + $0x10] sm:$0xff]   ;;  %s7502_s22 = scalar_lea.vmem %s7594_s3, %s6659_s17 }
  0x13   : > { %5838 = vmatprep.mubr.msk.bf16.mxu1 %vm429_vm1, %v6684_v6  ;;  %v6686_v10 = vld [vmem:[%s6944_s27 + $0x8] sm:$0xfe]   ;;  %v6688_v12 = vld [vmem:[%s6944_s27 + $0x10] sm:$0xff]   ;;  %v2561_v15 = vshrl.u32 %v6687_v11, 16  ;;  %v2564_v16 = vshll.u32 %v6687_v11, 16  ;;  %v6689_v17 = vld [vmem:[%s6944_s27 + $0x18] sm:$0xff]  }
  0x14   : > { %5839 = vmatmul.mubr.msk.bf16.vlgmr.msra.gmra.mrb[0].mxu1 %vm429_vm1, %v6685_v8  ;;  %v2553_v13 = vshrl.u32 %v6686_v10, 16  ;;  %v2556_v14 = vshll.u32 %v6686_v10, 16  ;;  %v2570_v23 = vshrl.u32 %v6689_v17, 16  ;;  %v2573_v24 = vshll.u32 %v6689_v17, 16  ;;  %v6690_v25 = vld [vmem:[%s6944_s27 + $0x18] sm:$0xff]   ;;  %v6691_v26 = vld [vmem:[%s6944_s27 + $0x20] sm:$0xff]  }
  0x15   : > { %5875 = vmatpush3.bf16.msra.mxu1 %v1109_v9  ;;  %5842 = vmatprep.mubr.msk.bf16.mxu1 %vm429_vm1, %v6688_v12  ;;  %v2563_v21 = vrot.slane %v2561_v15, 1  ;;  %v2566_v22 = vrot.slane %v2564_v16, 2  ;;  %v2579_v31 = vshrl.u32 %v6691_v26, 16  ;;  %v2582_v32 = vshll.u32 %v6691_v26, 16  ;;  %v6692_v33 = vld [vmem:[%s6944_s27 + $0x20] sm:$0xff]   ;;  %v6693_v34 = vld [vmem:[%s6944_s27 + $0x28] sm:$0xff]  }
  0x16   : > { %6650 = vmatprep.subr.msk.bf16.mxu1 %vm484_vm0, %v6950_v7  ;;  %v2555_v19 = vrot.slane %v2553_v13, 1  ;;  %v2558_v20 = vrot.slane %v2556_v14, 2  ;;  %v2572_v29 = vrot.slane %v2570_v23, 1  ;;  %v2575_v30 = vrot.slane %v2573_v24, 2  ;;  %v6694_v42 = vld [vmem:[%s6944_s27 + $0x28] sm:$0xff]   ;;  %v6695_v43 = vld [vmem:[%s6944_s27 + $0x30] sm:$0xff]  }
  0x17   : > { %v2567_v28 = vor.u32 %v2566_v22, %v2563_v21  ;;  %v2581_v37 = vrot.slane %v2579_v31, 1  ;;  %v2584_v38 = vrot.slane %v2582_v32, 2  ;;  %v2588_v39 = vshrl.u32 %v6693_v34, 16  ;;  %v6696_v47 = vld [vmem:[%s6944_s27 + $0x30] sm:$0xff]   ;;  %v6697_v51 = vld [vmem:[%s6944_s27 + $0x38] sm:$0xff]   ;;  %v6699_v58 = vld [vmem:[%s6944_s27 + $0x40] sm:$0xff]  }
  0x18   : > { %v2559_v27 = vor.u32 %v2558_v20, %v2555_v19  ;;  %v2576_v36 = vor.u32 %v2575_v30, %v2572_v29  ;;  %v2591_v41 = vshll.u32 %v6693_v34, 16  ;;  %v2597_v49 = vshrl.u32 %v6695_v43, 16  ;;  %v6701_v1 = vld [vmem:[%s6944_s27 + $0x48] sm:$0xff]   ;;  %v6698_v3 = vld [vmem:[%s6944_s27 + $0x38] sm:$0xff]   ;;  %v6703_v8 = vld [vmem:[%s6944_s27 + $0x50] sm:$0xff]  }
  0x19   : > { %v2585_v45 = vor.u32 %v2584_v38, %v2581_v37  ;;  %v2590_v46 = vrot.slane %v2588_v39, 1  ;;  %v2600_v50 = vshll.u32 %v6695_v43, 16  ;;  %v2606_v56 = vshrl.u32 %v6697_v51, 16  ;;  %v6700_v12 = vld [vmem:[%s6944_s27 + $0x40] sm:$0xff]   ;;  %v6702_v23 = vld [vmem:[%s6944_s27 + $0x48] sm:$0xff]   ;;  %v6704_v24 = vld [vmem:[%s6944_s27 + $0x50] sm:$0xff]  }
  0x1a   : > { %v2568_v35 = vsel %vm2551_vm2, %v2559_v27, %v2567_v28  ;;  %v2577_v44 = vsel %vm2551_vm2, %v2567_v28, %v2576_v36  ;;  %v2593_v48 = vrot.slane %v2591_v41, 2  ;;  %v2599_v54 = vrot.slane %v2597_v49, 1  ;;  %v6708_v29 = vld [vmem:[%s6944_s27 + $0x10] sm:$0xff]   ;;  %v6707_v34 = vld [vmem:[%s6944_s27 + $0x8] sm:$0xfc]   ;;  %v6709_v37 = vld [vmem:[%s6944_s27 + $0x60] sm:$0xff]  }
  0x1b   : > { %5990 = vmatprep.mubr.msk.bf16.mxu0 %vm429_vm1, %v2568_v35  ;;  %v2586_v52 = vsel %vm2551_vm2, %v2576_v36, %v2585_v45  ;;  %v2602_v55 = vrot.slane %v2600_v50, 2  ;;  %v2609_v57 = vshll.u32 %v6697_v51, 16  ;;  %v2608_v60 = vrot.slane %v2606_v56, 1  ;;  %v6706_v35 = vld [vmem:[%s6944_s27 + $0x58] sm:$0xff]   ;;  %v6721_v49 = vld [vmem:[%s6944_s27] sm:$0xff]   ;;  %v6714_v50 = vld [vmem:[%s6944_s27 + $0x28] sm:$0xff]  }
  0x1c   : > { %5843 = vmatmul.mubr.msk.bf16.gmra.mrb[4].mxu1 %vm429_vm1, %v6690_v25  ;;  %5991 = vmatmul.mubr.msk.bf16.vlgmr.msra.gmra.mrb[0].mxu0 %vm429_vm1, %v2577_v44  ;;  %v2594_v53 = vor.u32 %v2593_v48, %v2590_v46  ;;  %v2615_v63 = vshrl.u32 %v6699_v58, 16  ;;  %v2618_v0 = vshll.u32 %v6699_v58, 16  ;;  %v2624_v9 = vshrl.u32 %v6701_v1, 16  ;;  %v6712_v44 = vld [vmem:[%s6944_s27 + $0x20] sm:$0xff]  }
  0x1d   : > { %5846 = vmatprep.mubr.msk.bf16.mxu1 %vm429_vm1, %v6692_v33  ;;  %6027 = vmatpush3.bf16.msra.mxu0 %v3289_v18  ;;  %v2603_v59 = vor.u32 %v2602_v55, %v2599_v54  ;;  %v2611_v62 = vrot.slane %v2609_v57, 2  ;;  %v2627_v10 = vshll.u32 %v6701_v1, 16  ;;  %v2633_v14 = vshrl.u32 %v6703_v8, 16  ;;  %v6705_v18 = vld [vmem:[%s6944_s27 + $0x58] sm:$0xff]   ;;  %v6716_v55 = vld [vmem:[%s6944_s27 + $0x30] sm:$0xff]  }
  0x1e   : > { %5994 = vmatprep.mubr.msk.bf16.mxu0 %vm429_vm1, %v2586_v52  ;;  %6655 = vmatprep.subr.msk.bf16.mxu0 %vm484_vm0, %v6975_v40  ;;  %v2595_v61 = vsel %vm2551_vm2, %v2585_v45, %v2594_v53  ;;  %v2617_v5 = vrot.slane %v2615_v63, 1  ;;  %v2620_v6 = vrot.slane %v2618_v0, 2  ;;  %v2636_v15 = vshll.u32 %v6703_v8, 16  ;;  %v6711_v45 = vld [vmem:[%s6944_s27 + $0x68] sm:$0xff]   ;;  %v6718_v0 = vld [vmem:[%s6944_s27 + $0x38] sm:$0xff]   ;;  %v6724_v1 = vld [vmem:[%s6944_s27 + $0x10] sm:$0xff]  }
  0x1f   : > { %v2604_v2 = vsel %vm2551_vm2, %v2594_v53, %v2603_v59  ;;  %v2612_v11 = vor.u32 %v2611_v62, %v2608_v60  ;;  %v2626_v16 = vrot.slane %v2624_v9, 1  ;;  %v2629_v17 = vrot.slane %v2627_v10, 2  ;;  %v6722_v53 = vld [vmem:[%s6944_s27 + $0x8] sm:$0xff]  }
  0x20   : > { %v2621_v13 = vor.u32 %v2620_v6, %v2617_v5  ;;  %v2635_v21 = vrot.slane %v2633_v14, 1  ;;  %v2638_v22 = vrot.slane %v2636_v15, 2  ;;  %v2642_v26 = vshrl.u32 %v6705_v18, 16  ;;  %v7043_v57 = vld [vmem:[%s7592_s1 + $0xe] sm:$0x3]  ;;  %v6726_v6 = vld [vmem:[%s6944_s27 + $0x18] sm:$0xff]  }
  0x21   : > { %v2613_v19 = vsel %vm2551_vm2, %v2603_v59, %v2612_v11  ;;  %v2630_v25 = vor.u32 %v2629_v17, %v2626_v16  ;;  %v2645_v27 = vshll.u32 %v6705_v18, 16  ;;  %v3197_v38 = vrot.slane %v6707_v34, 2  ;;  %v6715_v59 = vld [vmem:[%s6944_s27 + $0x78] sm:$0xff]   ;;  %v6719_v10 = vld [vmem:[%s6944_s27 + $0x88] sm:$0xff]  }
  0x22   : > { %v2622_v20 = vsel %vm2551_vm2, %v2612_v11, %v2621_v13  ;;  %v2639_v28 = vor.u32 %v2638_v22, %v2635_v21  ;;  %v2644_v31 = vrot.slane %v2642_v26, 1  ;;  %v3198_v39 = vrot.slane %v6708_v29, 2  ;;  %v6723_v18 = vld [vmem:[%s6944_s27 + $0x48] sm:$0xff]  }
  0x23   : > { %v2631_v30 = vsel %vm2551_vm2, %v2621_v13, %v2630_v25  ;;  %v2647_v32 = vrot.slane %v2645_v27, 2  ;;  %v3202_v48 = vrot.slane %v6712_v44, 2  ;;  %v3800_v52 = vsel %vm484_vm0, %v6975_v40, 0  ;;  %v6717_v40 = vld [vmem:[%s6944_s27 + $0x80] sm:$0xff]   ;;  %v6730_v27 = vld [vmem:[%s6944_s27 + $0x28] sm:$0xff]   ;;  %v6734_v44 = vld [vmem:[%s6944_s27 + $0x38] sm:$0xff]  }
  0x24   : > { %5847 = vmatmul.mubr.msk.bf16.gmra.mrb[8].mxu1 %vm429_vm1, %v6694_v42  ;;  %5995 = vmatmul.mubr.msk.bf16.gmra.mrb[4].mxu0 %vm429_vm1, %v2595_v61  ;;  %v2640_v33 = vsel %vm2551_vm2, %v2630_v25, %v2639_v28  ;;  %v6710_v42 = vld [vmem:[%s6944_s27 + $0x18] sm:$0xff]   ;;  %v3199_v43 = vsel %vm3196_vm3, %v3197_v38, %v3198_v39  ;;  %v909_v56 = vshll.u32 %v6721_v49, 16  ;;  %v3204_v58 = vrot.slane %v6714_v50, 2 }
  0x25   : > { %5850 = vmatprep.mubr.msk.bf16.mxu1 %vm429_vm1, %v6696_v47  ;;  %5998 = vmatprep.mubr.msk.bf16.mxu0 %vm429_vm1, %v2604_v2  ;;  %v7016_v36 = vor.u32 %v2647_v32, %v2644_v31  ;;  %v3200_v46 = vrot.slane %v6710_v42, 2  ;;  %v6713_v47 = vld [vmem:[%s6944_s27 + $0x70] sm:$0xff]   ;;  %v914_v60 = vshll.u32 %v6722_v53, 16  ;;  %v3206_v61 = vrot.slane %v6716_v55, 2  ;;  %v6727_v38 = vld [vmem:[%s6944_s27 + $0x58] sm:$0xff]  }
  0x26   : > { %v907_v62 = vshrl.u32 %v6721_v49, 16  ;;  %v911_v63 = vrot.slane %v909_v56, 1  ;;  %v3205_v2 = vsel %vm3196_vm3, %v3202_v48, %v3204_v58  ;;  %v922_v11 = vshll.u32 %v6724_v1, 16  ;;  %v6731_v56 = vld [vmem:[%s6944_s27 + $0x68] sm:$0xff]  }
  0x27   : > { %v2649_v41 = vsel %vm2551_vm2, %v2639_v28, %v7016_v36  ;;  %v3201_v51 = vsel %vm3196_vm3, %v3198_v39, %v3200_v46  ;;  %v3203_v54 = vsel %vm3196_vm3, %v3200_v46, %v3202_v48  ;;  %v916_v5 = vrot.slane %v914_v60, 1 }
  0x28   : > { %v3207_v8 = vsel %vm3196_vm3, %v3204_v58, %v3206_v61  ;;  %v912_v9 = vor.u32 %v911_v63, %v907_v62  ;;  %v918_v13 = vshrl.u32 %v6722_v53, 16  ;;  %v926_v16 = vshrl.u32 %v6724_v1, 16  ;;  %v6738_v1 = vld [vmem:[%s6944_s27 + $0x48] sm:$0xff]  }
  0x29   : > { %v930_v17 = vshll.u32 %v6726_v6, 16  ;;  %v1621_v28 = vsel %vm484_vm0, %v6950_v7, 0  ;;  %v3212_v29 = vrot.slane %v6723_v18, 2  ;;  %v6729_v7 = vld [vmem:[%s6944_s27 + $0x60] sm:$0xff]   ;;  %v3216_v48 = vrot.slane %v6727_v38, 2 }
  0x2a   : > { %v917_v15 = vsel %vm905_vm4, %v912_v9, %v916_v5  ;;  %v920_v22 = vor.u32 %v918_v13, %v916_v5  ;;  %v3218_v49 = vrot.slane %v6729_v7, 2  ;;  %v6735_v13 = vld [vmem:[%s6944_s27 + $0x78] sm:$0xff]   ;;  %v6737_v18 = vld [vmem:[%s6944_s27 + $0x80] sm:$0xff]  }
  0x2b   : > { %v932_v26 = vrot.slane %v930_v17, 1 }
  0x2c   : > { %5851 = vmatmul.mubr.msk.bf16.gmra.mrb[12].mxu1 %vm429_vm1, %v6698_v3  ;;  %5999 = vmatmul.mubr.msk.bf16.gmra.mrb[8].mxu0 %vm429_vm1, %v2613_v19  ;;  %v6720_v3 = vld [vmem:[%s6944_s27 + $0x40] sm:$0xff]   ;;  %v924_v19 = vrot.slane %v922_v11, 1  ;;  %v3219_v62 = vsel %vm3196_vm3, %v3216_v48, %v3218_v49  ;;  %v978_v11 = vshll.u32 %v6738_v1, 16 }
  0x2d   : > { %5854 = vmatprep.mubr.msk.bf16.mxu1 %vm429_vm1, %v6700_v12  ;;  %6002 = vmatprep.mubr.msk.bf16.mxu0 %vm429_vm1, %v2622_v20  ;;  %v3208_v12 = vrot.slane %v6718_v0, 2  ;;  %v3210_v14 = vrot.slane %v6720_v3, 2  ;;  %v6728_v20 = vld [vmem:[%s6944_s27 + $0x20] sm:$0xff]  }
  0x2e   : > { %v928_v25 = vor.u32 %v926_v16, %v924_v19  ;;  %v925_v31 = vsel %vm905_vm4, %v920_v22, %v924_v19  ;;  %v6742_v22 = vld [vmem:[%s6944_s27 + $0x58] sm:$0xff]  }
  0x2f   : > { %v3209_v21 = vsel %vm3196_vm3, %v3206_v61, %v3208_v12  ;;  %v3213_v42 = vsel %vm3196_vm3, %v3210_v14, %v3212_v29  ;;  %v6733_v61 = vld [vmem:[%s6944_s27 + $0x70] sm:$0xff]  }
  0x30   : > { %v933_v34 = vsel %vm905_vm4, %v928_v25, %v932_v26 }
  0x34   : > { %5855 = vmatmul.mubr.msk.bf16.gmra.mrb[16].mxu1 %vm429_vm1, %v6702_v23  ;;  %6003 = vmatmul.mubr.msk.bf16.gmra.mrb[12].mxu0 %vm429_vm1, %v2631_v30  ;;  %v6725_v23 = vld [vmem:[%s6944_s27 + $0x50] sm:$0xff]   ;;  %v938_v30 = vshll.u32 %v6728_v20, 16 }
  0x35   : > { %5858 = vmatprep.mubr.msk.bf16.mxu1 %vm429_vm1, %v6704_v24  ;;  %6006 = vmatprep.mubr.msk.bf16.mxu0 %vm429_vm1, %v2640_v33  ;;  %v3211_v24 = vsel %vm3196_vm3, %v3208_v12, %v3210_v14  ;;  %v3214_v32 = vrot.slane %v6725_v23, 2  ;;  %v934_v33 = vshrl.u32 %v6726_v6, 16  ;;  %v3222_v6 = vrot.slane %v6733_v61, 2  ;;  %v7104_v12 = vld [vmem:[%s7592_s1 + $0x6] sm:$0x3] }
  0x36   : > { %v940_v39 = vrot.slane %v938_v30, 1  ;;  %v3224_v23 = vrot.slane %v6735_v13, 2  ;;  %v994_v30 = vshll.u32 %v6742_v22, 16 }
  0x38   : > { %v996_v7 = vrot.slane %v994_v30, 1 }
  0x3c   : > { %5859 = vmatmul.mubr.msk.bf16.gmra.mrb[20].mxu1 %vm429_vm1, %v6706_v35  ;;  %6007 = vmatmul.mubr.msk.bf16.gmra.mrb[16].mxu0 %vm429_vm1, %v2649_v41  ;;  %v942_v35 = vshrl.u32 %v6728_v20, 16  ;;  %v6732_v41 = vld [vmem:[%s6944_s27 + $0x30] sm:$0xff]  }
  0x3d   : > { %5862 = vmatprep.mubr.msk.bf16.mxu1 %vm429_vm1, %v6709_v37  ;;  %6028 = vmatprep.mubr.msk.bf16.mxu0 %vm429_vm1, %v3199_v43  ;;  %v946_v37 = vshll.u32 %v6730_v27, 16  ;;  %v936_v43 = vor.u32 %v934_v33, %v932_v26  ;;  %v954_v50 = vshll.u32 %v6732_v41, 16  ;;  %v958_v53 = vshrl.u32 %v6732_v41, 16  ;;  %v6744_v33 = vld [vmem:[%s6944_s27 + $0x60] sm:$0xff]   ;;  %v6747_v41 = vld [vmem:[%s6944_s27 + $0x68] sm:$0xff]  }
  0x3e   : > { %v944_v46 = vor.u32 %v942_v35, %v940_v39  ;;  %v3226_v26 = vrot.slane %v6737_v18, 2  ;;  %v6755_v18 = vld [vmem:[%s6944_s27 + $0x88] sm:$0xff]  }
  0x3f   : > { %v956_v58 = vrot.slane %v954_v50, 1  ;;  %v1010_v50 = vshll.u32 %v6747_v41, 16 }
  0x40   : > { %v3227_v38 = vsel %vm3196_vm3, %v3224_v23, %v3226_v26 }
  0x41   : > { %v960_v63 = vor.u32 %v958_v53, %v956_v58 }
  0x44   : > { %5863 = vmatmul.mubr.msk.bf16.gmra.mrb[24].mxu1 %vm429_vm1, %v6711_v45  ;;  %6029 = vmatmul.mubr.msk.bf16.vlgmr.msra.gmra.mrb[0].mxu0 %vm429_vm1, %v3201_v51  ;;  %v3215_v45 = vsel %vm3196_vm3, %v3212_v29, %v3214_v32  ;;  %v941_v51 = vsel %vm905_vm4, %v936_v43, %v940_v39  ;;  %v1002_v43 = vshll.u32 %v6744_v33, 16 }
  0x45   : > { %5866 = vmatprep.mubr.msk.bf16.mxu1 %vm429_vm1, %v6713_v47  ;;  %6065 = vmatpush3.bf16.msra.mxu0 %v3800_v52  ;;  %v948_v47 = vrot.slane %v946_v37, 1  ;;  %v950_v52 = vshrl.u32 %v6730_v27, 16  ;;  %v982_v27 = vshrl.u32 %v6738_v1, 16  ;;  %v6741_v37 = vld [vmem:[%s6944_s27 + $0x90] sm:$0xff]   ;;  %v1014_v1 = vshrl.u32 %v6747_v41, 16 }
  0x46   : > { %6032 = vmatprep.mubr.msk.bf16.mxu0 %vm429_vm1, %v3203_v54  ;;  %6656 = vmatprep.subr.msk.bf16.mxu0 %vm484_vm0, %v7043_v57  ;;  %v962_v54 = vshll.u32 %v6734_v44, 16 }
  0x47   : > { %v949_v55 = vsel %vm905_vm4, %v944_v46, %v948_v47  ;;  %v952_v60 = vor.u32 %v950_v52, %v948_v47  ;;  %v998_v46 = vshrl.u32 %v6742_v22, 16  ;;  %v6749_v52 = vld [vmem:[%s6944_s27 + $0x70] sm:$0xff]  }
  0x48   : > { %v964_v0 = vrot.slane %v962_v54, 1 }
  0x49   : > { %v957_v5 = vsel %vm905_vm4, %v952_v60, %v956_v58  ;;  %v1000_v54 = vor.u32 %v998_v46, %v996_v7  ;;  %v6745_v58 = vld [vmem:[%s6944_s27 + $0x10] sm:$0xfc]   ;;  %v6751_v60 = vld [vmem:[%s6944_s27 + $0x78] sm:$0xff]   ;;  %v6756_v46 = vld [vmem:[%s6944_s27 + $0x40] sm:$0xff]  }
  0x4a   : > { %v965_v9 = vsel %vm905_vm4, %v960_v63, %v964_v0 }
  0x4c   : > { %5867 = vmatmul.mubr.msk.bf16.gmra.mrb[28].mxu1 %vm429_vm1, %v6715_v59  ;;  %6033 = vmatmul.mubr.msk.bf16.gmra.mrb[4].mxu0 %vm429_vm1, %v3205_v2  ;;  %v6736_v59 = vld [vmem:[%s6944_s27 + $0x40] sm:$0xff]   ;;  %v3220_v2 = vrot.slane %v6731_v56, 2 }
  0x4d   : > { %5870 = vmatprep.mubr.msk.bf16.mxu1 %vm429_vm1, %v6717_v40  ;;  %6036 = vmatprep.mubr.msk.bf16.mxu0 %vm429_vm1, %v3207_v8  ;;  %v3217_v40 = vsel %vm3196_vm3, %v3214_v32, %v3216_v48  ;;  %v970_v3 = vshll.u32 %v6736_v59, 16  ;;  %v966_v8 = vshrl.u32 %v6734_v44, 16  ;;  %v6743_v48 = vld [vmem:[%s6944_s27 + $0x98] ss:$0 sps:$4 sm:$0x33]  }
  0x4e   : > { %v3221_v16 = vsel %vm3196_vm3, %v3218_v49, %v3220_v2  ;;  %v3223_v19 = vsel %vm3196_vm3, %v3220_v2, %v3222_v6  ;;  %v1006_v49 = vshrl.u32 %v6744_v33, 16  ;;  %v3232_v61 = vrot.slane %v6743_v48, 2 }
  0x4f   : > { %v972_v14 = vrot.slane %v970_v3, 1  ;;  %v968_v17 = vor.u32 %v966_v8, %v964_v0  ;;  %v3708_v2 = vrot.slane %v6745_v58, 2  ;;  %v6753_v8 = vld [vmem:[%s6944_s27 + $0x80] sm:$0xff]   ;;  %v4445_v33 = vsel %vm484_vm0, %v7043_v57, 0 }
  0x51   : > { %v973_v25 = vsel %vm905_vm4, %v968_v17, %v972_v14 }
  0x54   : > { %5871 = vmatmul.mubr.msk.bf16.gmra.mrb[32].mxu1 %vm429_vm1, %v6719_v10  ;;  %6037 = vmatmul.mubr.msk.bf16.gmra.mrb[8].mxu0 %vm429_vm1, %v3209_v21  ;;  %v974_v10 = vshrl.u32 %v6736_v59, 16  ;;  %v980_v21 = vrot.slane %v978_v11, 1  ;;  %v6748_v11 = vld [vmem:[%s6944_s27 + $0x20] sm:$0xff]  }
  0x55   : > { %5876 = vmatprep.mubr.msk.bf16.mxu1 %vm429_vm1, %v917_v15  ;;  %6040 = vmatprep.mubr.msk.bf16.mxu0 %vm429_vm1, %v3211_v24  ;;  %v6740_v15 = vld [vmem:[%s6944_s27 + $0x50] sm:$0xff]  }
  0x56   : > { %v976_v20 = vor.u32 %v974_v10, %v972_v14  ;;  %v986_v24 = vshll.u32 %v6740_v15, 16  ;;  %v990_v29 = vshrl.u32 %v6740_v15, 16  ;;  %v984_v35 = vor.u32 %v982_v27, %v980_v21  ;;  %v6750_v14 = vld [vmem:[%s6944_s27 + $0x28] sm:$0xff]   ;;  %v6752_v27 = vld [vmem:[%s6944_s27 + $0x30] sm:$0xff]  }
  0x57   : > { %v3713_v22 = vrot.slane %v6750_v14, 2 }
  0x58   : > { %v988_v32 = vrot.slane %v986_v24, 1 }
  0x5a   : > { %v992_v39 = vor.u32 %v990_v29, %v988_v32  ;;  %v989_v44 = vsel %vm905_vm4, %v984_v35, %v988_v32  ;;  %v6757_v29 = vld [vmem:[%s6944_s27 + $0x90] ss:$0 sps:$4 sm:$0x11]   ;;  %v6754_v32 = vld [vmem:[%s6944_s27 + $0x38] sm:$0xff]  }
  0x5b   : > { %v3717_v41 = vrot.slane %v6754_v32, 2  ;;  %v6774_v32 = vld [vmem:[%s6944_s27 + $0x40] sm:$0xff]  }
  0x5c   : > { %5877 = vmatmul.mubr.msk.bf16.vlgmr.msra.gmra.mrb[0].mxu1 %vm429_vm1, %v925_v31  ;;  %6041 = vmatmul.mubr.msk.bf16.gmra.mrb[12].mxu0 %vm429_vm1, %v3213_v42  ;;  %v6739_v31 = vld [vmem:[%s6944_s27 + $0x88] sm:$0xff]   ;;  %v997_v47 = vsel %vm905_vm4, %v992_v39, %v996_v7  ;;  %v1050_v39 = vshll.u32 %v6757_v29, 16  ;;  %v3715_v7 = vrot.slane %v6752_v27, 2 }
  0x5d   : > { %5913 = vmatpush3.bf16.msra.mxu1 %v1621_v28  ;;  %5880 = vmatprep.mubr.msk.bf16.mxu1 %vm429_vm1, %v933_v34  ;;  %v981_v28 = vsel %vm905_vm4, %v976_v20, %v980_v21  ;;  %v3225_v34 = vsel %vm3196_vm3, %v3222_v6, %v3224_v23  ;;  %v3228_v42 = vrot.slane %v6739_v31, 2  ;;  %v1026_v6 = vshll.u32 %v6751_v60, 16 }
  0x5e   : > { %6044 = vmatprep.mubr.msk.bf16.mxu0 %vm429_vm1, %v3215_v45  ;;  %6651 = vmatprep.subr.msk.bf16.mxu1 %vm484_vm0, %v7104_v12  ;;  %v3230_v45 = vrot.slane %v6741_v37, 2  ;;  %v3711_v20 = vrot.slane %v6748_v11, 2  ;;  %v1030_v23 = vshrl.u32 %v6751_v60, 16  ;;  %v3716_v48 = vsel %vm3196_vm3, %v3713_v22, %v3715_v7 }
  0x5f   : > { %v3229_v53 = vsel %vm3196_vm3, %v3226_v26, %v3228_v42  ;;  %v1028_v17 = vrot.slane %v1026_v6, 1  ;;  %v1042_v26 = vshll.u32 %v6755_v18, 16  ;;  %v6766_v6 = vld [vmem:[%s6944_s27 + $0x20] sm:$0xff]  }
  0x60   : > { %v3231_v56 = vsel %vm3196_vm3, %v3228_v42, %v3230_v45  ;;  %v3233_v10 = vsel %vm3196_vm3, %v3230_v45, %v3232_v61  ;;  %v1046_v42 = vshrl.u32 %v6755_v18, 16  ;;  %v6759_v45 = vld [vmem:[%s6944_s27] sm:$0xfe]   ;;  %v6761_v61 = vld [vmem:[%s6944_s27 + $0x50] sm:$0xff]   ;;  %v1536_v14 = vrot.slane %v6766_v6, 1 }
  0x61   : > { %v1032_v31 = vor.u32 %v1030_v23, %v1028_v17  ;;  %v1044_v37 = vrot.slane %v1042_v26, 1  ;;  %v6772_v23 = vld [vmem:[%s6944_s27 + $0x38] sm:$0xff]   ;;  %v6786_v6 = vld [vmem:[%s6944_s27 + $0x20] sm:$0xff]  }
  0x62   : > { %v1542_v29 = vrot.slane %v6772_v23, 1 }
  0x64   : > { %5881 = vmatmul.mubr.msk.bf16.gmra.mrb[4].mxu1 %vm429_vm1, %v941_v51  ;;  %6045 = vmatmul.mubr.msk.bf16.gmra.mrb[16].mxu0 %vm429_vm1, %v3217_v40  ;;  %v1004_v51 = vrot.slane %v1002_v43, 1  ;;  %v1012_v40 = vrot.slane %v1010_v50, 1  ;;  %v6760_v43 = vld [vmem:[%s6944_s27 + $0x8] sm:$0xff]   ;;  %v3718_v50 = vsel %vm3196_vm3, %v3715_v7, %v3717_v41  ;;  %v1544_v7 = vrot.slane %v6774_v32, 1 }
  0x65   : > { %5884 = vmatprep.mubr.msk.bf16.mxu1 %vm429_vm1, %v949_v55  ;;  %6048 = vmatprep.mubr.msk.bf16.mxu0 %vm429_vm1, %v3219_v62  ;;  %v6746_v55 = vld [vmem:[%s6944_s27 + $0x18] sm:$0xff]   ;;  %v1018_v62 = vshll.u32 %v6749_v52, 16 }
  0x66   : > { %v1008_v59 = vor.u32 %v1006_v49, %v1004_v51  ;;  %v1005_v63 = vsel %vm905_vm4, %v1000_v54, %v1004_v51  ;;  %v3709_v0 = vrot.slane %v6746_v55, 2  ;;  %v1016_v13 = vor.u32 %v1014_v1, %v1012_v40  ;;  %v6758_v51 = vld [vmem:[%s6944_s27 + $0x48] sm:$0xff]  }
  0x67   : > { %v1048_v49 = vor.u32 %v1046_v42, %v1044_v37  ;;  %v3719_v54 = vrot.slane %v6756_v46, 2  ;;  %v3721_v58 = vrot.slane %v6758_v51, 2 }
  0x68   : > { %v1013_v3 = vsel %vm905_vm4, %v1008_v59, %v1012_v40  ;;  %v3710_v15 = vsel %vm3196_vm3, %v3708_v2, %v3709_v0  ;;  %v3712_v30 = vsel %vm3196_vm3, %v3709_v0, %v3711_v20  ;;  %v6764_v40 = vld [vmem:[%s6944_s27 + $0x18] sm:$0xff]   ;;  %v3723_v2 = vrot.slane %v6761_v61, 2  ;;  %v6781_v61 = vld [vmem:[%s6944_s27 + $0xa0] ss:$0 sps:$4 sm:$0x33]  }
  0x69   : > { %v3720_v60 = vsel %vm3196_vm3, %v3717_v41, %v3719_v54  ;;  %v6763_v0 = vld [vmem:[%s6944_s27 + $0x58] sm:$0xff]   ;;  %v1534_v1 = vrot.slane %v6764_v40, 1  ;;  %v6775_v41 = vld [vmem:[%s6944_s27 + $0x88] sm:$0xff]  }
  0x6a   : > { %v3724_v11 = vsel %vm3196_vm3, %v3721_v58, %v3723_v2  ;;  %v3737_v46 = vrot.slane %v6775_v41, 2  ;;  %v6785_v40 = vld [vmem:[%s6944_s27 + $0x68] sm:$0xff]  }
  0x6c   : > { %5885 = vmatmul.mubr.msk.bf16.gmra.mrb[8].mxu1 %vm429_vm1, %v957_v5  ;;  %6049 = vmatmul.mubr.msk.bf16.gmra.mrb[20].mxu0 %vm429_vm1, %v3221_v16  ;;  %v1022_v5 = vshrl.u32 %v6749_v52, 16  ;;  %v1529_v52 = vrot.slane %v6759_v45, 1  ;;  %v6778_v45 = vld [vmem:[%s6944_s27 + $0x50] sm:$0xff]  }
  0x6d   : > { %5888 = vmatprep.mubr.msk.bf16.mxu1 %vm429_vm1, %v965_v9  ;;  %6052 = vmatprep.mubr.msk.bf16.mxu0 %vm429_vm1, %v3223_v19  ;;  %v1020_v9 = vrot.slane %v1018_v62, 1  ;;  %v1034_v19 = vshll.u32 %v6753_v8, 16  ;;  %v1548_v51 = vrot.slane %v6778_v45, 1 }
  0x6f   : > { %v1024_v16 = vor.u32 %v1022_v5, %v1020_v9  ;;  %v1021_v21 = vsel %vm905_vm4, %v1016_v13, %v1020_v9  ;;  %v2132_v5 = vsel %vm484_vm0, %v7104_v12, 0  ;;  %v6765_v13 = vld [vmem:[%s6944_s27 + $0x60] sm:$0xff]   ;;  %v6767_v12 = vld [vmem:[%s6944_s27 + $0x68] sm:$0xff]  }
  0x70   : > { %v3727_v18 = vrot.slane %v6765_v13, 2  ;;  %v6788_v13 = vld [vmem:[%s6944_s27 + $0x28] sm:$0xff]  }
  0x71   : > { %v1029_v24 = vsel %vm905_vm4, %v1024_v16, %v1028_v17  ;;  %v6854_v17 = vld [vmem:[%s7592_s1 + $0x8] sm:$0x3] }
  0x74   : > { %5889 = vmatmul.mubr.msk.bf16.gmra.mrb[12].mxu1 %vm429_vm1, %v973_v25  ;;  %6053 = vmatmul.mubr.msk.bf16.gmra.mrb[24].mxu0 %vm429_vm1, %v3225_v34  ;;  %v1038_v25 = vshrl.u32 %v6753_v8, 16  ;;  %v3714_v34 = vsel %vm3196_vm3, %v3711_v20, %v3713_v22  ;;  %v3725_v8 = vrot.slane %v6763_v0, 2  ;;  %v6770_v20 = vld [vmem:[%s6944_s27 + $0x30] sm:$0xff]  }
  0x75   : > { %5892 = vmatprep.mubr.msk.bf16.mxu1 %vm429_vm1, %v981_v28  ;;  %6056 = vmatprep.mubr.msk.bf16.mxu0 %vm429_vm1, %v3227_v38  ;;  %v1036_v28 = vrot.slane %v1034_v19, 1  ;;  %v7169_v38 = vld [vmem:[%s7592_s1 + $0x10] sm:$0x3]  ;;  %v1537_v19 = vsel %vm1528_vm5, %v1534_v1, %v1536_v14  ;;  %v1540_v26 = vrot.slane %v6770_v20, 1  ;;  %v4241_v20 = vshll.u32 %v6786_v6, 16 }
  0x77   : > { %v1040_v35 = vor.u32 %v1038_v25, %v1036_v28  ;;  %v1037_v57 = vsel %vm905_vm4, %v1032_v31, %v1036_v28  ;;  %v6769_v25 = vld [vmem:[%s6944_s27 + $0x70] sm:$0xff]   ;;  %v6771_v28 = vld [vmem:[%s6944_s27 + $0x78] sm:$0xff]  }
  0x7c   : > { %5893 = vmatmul.mubr.msk.bf16.gmra.mrb[16].mxu1 %vm429_vm1, %v989_v44  ;;  %6057 = vmatmul.mubr.msk.bf16.gmra.mrb[28].mxu0 %vm429_vm1, %v3229_v53  ;;  %v1045_v44 = vsel %vm905_vm4, %v1040_v35, %v1044_v37  ;;  %v1530_v53 = vrot.slane %v6760_v43, 1  ;;  %v6776_v35 = vld [vmem:[%s6944_s27 + $0x48] sm:$0xff]  }
  0x7d   : > { %5896 = vmatprep.mubr.msk.bf16.mxu1 %vm429_vm1, %v997_v47  ;;  %6060 = vmatprep.mubr.msk.bf16.mxu0 %vm429_vm1, %v3231_v56  ;;  %v1052_v47 = vrot.slane %v1050_v39, 1  ;;  %v6762_v56 = vld [vmem:[%s6944_s27 + $0x10] sm:$0xff]   ;;  %v6773_v39 = vld [vmem:[%s6944_s27 + $0x80] sm:$0xff]   ;;  %v1546_v42 = vrot.slane %v6776_v35, 1 }
  0x7e   : > { %v1531_v59 = vsel %vm1528_vm5, %v1529_v52, %v1530_v53  ;;  %v1532_v62 = vrot.slane %v6762_v56, 1  ;;  %v3735_v43 = vrot.slane %v6773_v39, 2  ;;  %v6784_v52 = vld [vmem:[%s6944_s27 + $0x18] sm:$0xff]   ;;  %v6783_v56 = vld [vmem:[%s6944_s27 + $0x10] sm:$0xfc]   ;;  %v6791_v39 = vld [vmem:[%s6944_s27 + $0x80] sm:$0xff]  }
  0x7f   : > { %v1053_v55 = vsel %vm905_vm4, %v1048_v49, %v1052_v47  ;;  %v1547_v47 = vsel %vm1528_vm5, %v1544_v7, %v1546_v42  ;;  %v6777_v49 = vld [vmem:[%s6944_s27 + $0x90] sm:$0xff]  }
  0x80   : > { %v1535_v9 = vsel %vm1528_vm5, %v1532_v62, %v1534_v1 }
  0x84   : > { %5897 = vmatmul.mubr.msk.bf16.gmra.mrb[20].mxu1 %vm429_vm1, %v1005_v63  ;;  %6061 = vmatmul.mubr.msk.bf16.gmra.mrb[32].mxu0 %vm429_vm1, %v3233_v10  ;;  %v3722_v63 = vsel %vm3196_vm3, %v3719_v54, %v3721_v58  ;;  %v6768_v10 = vld [vmem:[%s6944_s27 + $0x28] sm:$0xff]   ;;  %v6779_v54 = vld [vmem:[%s6944_s27 + $0x98] sm:$0xff]   ;;  %v6782_v58 = vld [vmem:[%s6944_s27 + $0x60] sm:$0xff]  }
  0x85   : > { %5900 = vmatprep.mubr.msk.bf16.mxu1 %vm429_vm1, %v1013_v3  ;;  %6066 = vmatprep.mubr.msk.bf16.mxu0 %vm429_vm1, %v3710_v15  ;;  %v1533_v3 = vsel %vm1528_vm5, %v1530_v53, %v1532_v62  ;;  %v3726_v15 = vsel %vm3196_vm3, %v3723_v2, %v3725_v8  ;;  %v1538_v16 = vrot.slane %v6768_v10, 1  ;;  %v3738_v53 = vsel %vm3196_vm3, %v3735_v43, %v3737_v46 }
  0x86   : > { %v4229_v62 = vshrl.u32 %v6784_v52, 16  ;;  %v3741_v0 = vrot.slane %v6779_v54, 2  ;;  %v4221_v2 = vshrl.u32 %v6783_v56, 16 }
  0x87   : > { %v1539_v22 = vsel %vm1528_vm5, %v1536_v14, %v1538_v16  ;;  %v1541_v31 = vsel %vm1528_vm5, %v1538_v16, %v1540_v26  ;;  %v3743_v16 = vrot.slane %v6781_v61, 2 }
  0x8c   : > { %5901 = vmatmul.mubr.msk.bf16.gmra.mrb[24].mxu1 %vm429_vm1, %v1021_v21  ;;  %6067 = vmatmul.mubr.msk.bf16.vlgmr.msra.gmra.mrb[0].mxu0 %vm429_vm1, %v3712_v30  ;;  %v3729_v21 = vrot.slane %v6767_v12, 2  ;;  %v3731_v30 = vrot.slane %v6769_v25, 2  ;;  %v4250_v25 = vshll.u32 %v6788_v13, 16 }
  0x8d   : > { %5904 = vmatprep.mubr.msk.bf16.mxu1 %vm429_vm1, %v1029_v24  ;;  %6103 = vmatpush3.bf16.msra.mxu0 %v4445_v33  ;;  %v3728_v24 = vsel %vm3196_vm3, %v3725_v8, %v3727_v18  ;;  %v3733_v33 = vrot.slane %v6771_v28, 2  ;;  %v6790_v28 = vld [vmem:[%s6944_s27 + $0x30] sm:$0xff]  }
  0x8e   : > { %6070 = vmatprep.mubr.msk.bf16.mxu0 %vm429_vm1, %v3714_v34  ;;  %6657 = vmatprep.subr.msk.bf16.mxu0 %vm484_vm0, %v7169_v38  ;;  %v3730_v27 = vsel %vm3196_vm3, %v3727_v18, %v3729_v21  ;;  %v1543_v34 = vsel %vm1528_vm5, %v1540_v26, %v1542_v29  ;;  %v3732_v37 = vsel %vm3196_vm3, %v3729_v21, %v3731_v30  ;;  %v6787_v18 = vld [vmem:[%s6944_s27 + $0x70] sm:$0xff]   ;;  %v4247_v21 = vshrl.u32 %v6788_v13, 16  ;;  %v6789_v26 = vld [vmem:[%s6944_s27 + $0x78] sm:$0xff]  }
  0x8f   : > { %v4252_v35 = vrot.slane %v4250_v25, 3  ;;  %v6799_v13 = vld [vmem:[%s6944_s27 + $0x50] sm:$0xff]  }
  0x90   : > { %v4249_v32 = vrot.slane %v4247_v21, 2  ;;  %v4295_v21 = vshll.u32 %v6799_v13, 16 }
  0x92   : > { %v4253_v45 = vor.u32 %v4252_v35, %v4249_v32  ;;  %v6803_v32 = vld [vmem:[%s6944_s27 + $0x60] sm:$0xff]  }
  0x94   : > { %5905 = vmatmul.mubr.msk.bf16.gmra.mrb[28].mxu1 %vm429_vm1, %v1037_v57  ;;  %6071 = vmatmul.mubr.msk.bf16.gmra.mrb[4].mxu0 %vm429_vm1, %v3716_v48  ;;  %v3734_v57 = vsel %vm3196_vm3, %v3731_v30, %v3733_v33  ;;  %v6780_v48 = vld [vmem:[%s6944_s27 + $0x58] sm:$0xff]  }
  0x95   : > { %5908 = vmatprep.mubr.msk.bf16.mxu1 %vm429_vm1, %v1045_v44  ;;  %6074 = vmatprep.mubr.msk.bf16.mxu0 %vm429_vm1, %v3718_v50  ;;  %v1545_v44 = vsel %vm1528_vm5, %v1542_v29, %v1544_v7  ;;  %v3736_v50 = vsel %vm3196_vm3, %v3733_v33, %v3735_v43  ;;  %v3744_v29 = vsel %vm3196_vm3, %v3741_v0, %v3743_v16  ;;  %v6792_v33 = vld [vmem:[%s6944_s27 + $0x38] sm:$0xff]   ;;  %v4256_v7 = vshrl.u32 %v6790_v28, 16 }
  0x96   : > { %v4265_v43 = vshrl.u32 %v6792_v33, 16 }
  0x9c   : > { %5909 = vmatmul.mubr.msk.bf16.gmra.mrb[32].mxu1 %vm429_vm1, %v1053_v55  ;;  %6075 = vmatmul.mubr.msk.bf16.gmra.mrb[8].mxu0 %vm429_vm1, %v3720_v60  ;;  %v1550_v55 = vrot.slane %v6780_v48, 1  ;;  %v1549_v60 = vsel %vm1528_vm5, %v1546_v42, %v1548_v51  ;;  %v4258_v48 = vrot.slane %v4256_v7, 2 }
  0x9d   : > { %5914 = vmatprep.mubr.msk.bf16.mxu1 %vm429_vm1, %v1531_v59  ;;  %6078 = vmatprep.mubr.msk.bf16.mxu0 %vm429_vm1, %v3722_v63  ;;  %v3739_v59 = vrot.slane %v6777_v49, 2  ;;  %v4232_v63 = vshll.u32 %v6784_v52, 16 }
  0x9e   : > { %v1551_v1 = vsel %vm1528_vm5, %v1548_v51, %v1550_v55  ;;  %v6794_v51 = vld [vmem:[%s6944_s27 + $0x40] sm:$0xff]  }
  0x9f   : > { %v3740_v8 = vsel %vm3196_vm3, %v3737_v46, %v3739_v59  ;;  %v4234_v10 = vrot.slane %v4232_v63, 3  ;;  %v3742_v14 = vsel %vm3196_vm3, %v3739_v59, %v3741_v0  ;;  %v6796_v59 = vld [vmem:[%s6944_s27 + $0x48] sm:$0xff]   ;;  %v4277_v63 = vshll.u32 %v6794_v51, 16  ;;  %v6795_v0 = vld [vmem:[%s6944_s27 + $0x90] ss:$0 sps:$4 sm:$0x11]  }
  0xa4   : > { %5915 = vmatmul.mubr.msk.bf16.vlgmr.msra.gmra.mrb[0].mxu1 %vm429_vm1, %v1533_v3  ;;  %6079 = vmatmul.mubr.msk.bf16.gmra.mrb[12].mxu0 %vm429_vm1, %v3724_v11  ;;  %v4224_v3 = vshll.u32 %v6783_v56, 16  ;;  %v1554_v11 = vrot.slane %v6785_v40, 1 }
  0xa5   : > { %5951 = vmatpush3.bf16.msra.mxu1 %v2132_v5  ;;  %5918 = vmatprep.mubr.msk.bf16.mxu1 %vm429_vm1, %v1535_v9  ;;  %v1552_v5 = vrot.slane %v6782_v58, 1  ;;  %v4231_v9 = vrot.slane %v4229_v62, 2  ;;  %v4274_v62 = vshrl.u32 %v6794_v51, 16 }
  0xa6   : > { %6653 = vmatprep.subr.msk.bf16.mxu1 %vm484_vm0, %v6854_v17  ;;  %6082 = vmatprep.mubr.msk.bf16.mxu0 %vm429_vm1, %v3726_v15  ;;  %v4223_v15 = vrot.slane %v4221_v2, 2  ;;  %v4226_v12 = vrot.slane %v4224_v3, 3  ;;  %v4238_v17 = vshrl.u32 %v6786_v6, 16  ;;  %v4286_v2 = vshll.u32 %v6796_v59, 16  ;;  %v6797_v3 = vld [vmem:[%s6944_s27 + $0x8] sm:$0xfe]  }
  0xa7   : > { %v4235_v23 = vor.u32 %v4234_v10, %v4231_v9  ;;  %v4276_v9 = vrot.slane %v4274_v62, 2  ;;  %v4279_v10 = vrot.slane %v4277_v63, 3  ;;  %v6808_v62 = vld [vmem:[%s6944_s27 + $0x38] sm:$0xff]  }
  0xa8   : > { %v4240_v30 = vrot.slane %v4238_v17, 2  ;;  %v6801_v17 = vld [vmem:[%s6944_s27 + $0x58] sm:$0xff]  }
  0xa9   : > { %v4301_v25 = vshrl.u32 %v6801_v17, 16 }
  0xac   : > { %5919 = vmatmul.mubr.msk.bf16.gmra.mrb[4].mxu1 %vm429_vm1, %v1537_v19  ;;  %6083 = vmatmul.mubr.msk.bf16.gmra.mrb[16].mxu0 %vm429_vm1, %v3728_v24  ;;  %v1553_v19 = vsel %vm1528_vm5, %v1550_v55, %v1552_v5  ;;  %v1555_v24 = vsel %vm1528_vm5, %v1552_v5, %v1554_v11  ;;  %v4957_v55 = vsel %vm484_vm0, %v7169_v38, 0  ;;  %v6798_v5 = vld [vmem:[%s6944_s27 + $0x10] sm:$0xff]  }
  0xad   : > { %5922 = vmatprep.mubr.msk.bf16.mxu1 %vm429_vm1, %v1539_v22  ;;  %6086 = vmatprep.mubr.msk.bf16.mxu0 %vm429_vm1, %v3730_v27  ;;  %v4227_v22 = vor.u32 %v4226_v12, %v4223_v15  ;;  %v1556_v27 = vrot.slane %v6787_v18, 1  ;;  %v4288_v15 = vrot.slane %v4286_v2, 3  ;;  %v2040_v12 = vrot.slane %v6797_v3, 1  ;;  %v6810_v2 = vld [vmem:[%s6944_s27 + $0x40] sm:$0xff]  }
  0xae   : > { %v2041_v16 = vrot.slane %v6798_v5, 1  ;;  %v4280_v18 = vor.u32 %v4279_v10, %v4276_v9  ;;  %v6811_v9 = vld [vmem:[%s6944_s27 + $0x80] sm:$0xff]  }
  0xaf   : > { %v1557_v42 = vsel %vm1528_vm5, %v1554_v11, %v1556_v27  ;;  %v1564_v11 = vrot.slane %v6795_v0, 1 }
  0xb4   : > { %5923 = vmatmul.mubr.msk.bf16.gmra.mrb[8].mxu1 %vm429_vm1, %v1541_v31  ;;  %6087 = vmatmul.mubr.msk.bf16.gmra.mrb[20].mxu0 %vm429_vm1, %v3732_v37  ;;  %v4243_v31 = vrot.slane %v4241_v20, 3  ;;  %v1558_v37 = vrot.slane %v6789_v26, 1  ;;  %v4292_v20 = vshrl.u32 %v6799_v13, 16  ;;  %v4304_v26 = vshll.u32 %v6801_v17, 16 }
  0xb5   : > { %5926 = vmatprep.mubr.msk.bf16.mxu1 %vm429_vm1, %v1543_v34  ;;  %6090 = vmatprep.mubr.msk.bf16.mxu0 %vm429_vm1, %v3734_v57  ;;  %v4236_v34 = vsel %vm4219_vm6, %v4227_v22, %v4235_v23  ;;  %v4259_v57 = vshll.u32 %v6790_v28, 16  ;;  %v6800_v22 = vld [vmem:[%s6944_s27 + $0x18] sm:$0xff]   ;;  %v4346_v17 = vshrl.u32 %v6811_v9, 16 }
  0xb6   : > { %v4244_v41 = vor.u32 %v4243_v31, %v4240_v30  ;;  %v1559_v46 = vsel %vm1528_vm5, %v1556_v27, %v1558_v37  ;;  %v6802_v27 = vld [vmem:[%s6944_s27 + $0x20] sm:$0xff]   ;;  %v4297_v30 = vrot.slane %v4295_v21, 3  ;;  %v2043_v31 = vrot.slane %v6800_v22, 1 }
  0xb7   : > { %v4261_v49 = vrot.slane %v4259_v57, 3  ;;  %v4306_v35 = vrot.slane %v4304_v26, 3  ;;  %v4348_v26 = vrot.slane %v4346_v17, 2 }
  0xb8   : > { %v4245_v52 = vsel %vm4219_vm6, %v4235_v23, %v4244_v41  ;;  %v4254_v56 = vsel %vm4219_vm6, %v4244_v41, %v4253_v45  ;;  %v2044_v57 = vsel %vm1528_vm5, %v2041_v16, %v2043_v31  ;;  %v4310_v41 = vshrl.u32 %v6803_v32, 16 }
  0xb9   : > { %v4262_v40 = vor.u32 %v4261_v49, %v4258_v48  ;;  %v6806_v48 = vld [vmem:[%s6944_s27 + $0x30] sm:$0xff]  }
  0xbb   : > { %v4263_v6 = vsel %vm4219_vm6, %v4253_v45, %v4262_v40 }
  0xbc   : > { %5927 = vmatmul.mubr.msk.bf16.gmra.mrb[12].mxu1 %vm429_vm1, %v1545_v44  ;;  %6091 = vmatmul.mubr.msk.bf16.gmra.mrb[24].mxu0 %vm429_vm1, %v3736_v50  ;;  %v4268_v44 = vshll.u32 %v6792_v33, 16  ;;  %v1560_v50 = vrot.slane %v6791_v39, 1  ;;  %v6805_v39 = vld [vmem:[%s6944_s27 + $0x68] sm:$0xff]  }
  0xbd   : > { %5930 = vmatprep.mubr.msk.bf16.mxu1 %vm429_vm1, %v1547_v47  ;;  %6094 = vmatprep.mubr.msk.bf16.mxu0 %vm429_vm1, %v3738_v53  ;;  %v6793_v47 = vld [vmem:[%s6944_s27 + $0x88] sm:$0xff]   ;;  %v4267_v53 = vrot.slane %v4265_v43, 2 }
  0xbe   : > { %v4270_v54 = vrot.slane %v4268_v44, 3  ;;  %v1562_v58 = vrot.slane %v6793_v47, 1  ;;  %v6804_v43 = vld [vmem:[%s6944_s27 + $0x28] sm:$0xff]   ;;  %v4322_v47 = vshll.u32 %v6805_v39, 16 }
  0xc0   : > { %v4271_v61 = vor.u32 %v4270_v54, %v4267_v53  ;;  %v1563_v38 = vsel %vm1528_vm5, %v1560_v50, %v1562_v58  ;;  %v6807_v53 = vld [vmem:[%s6944_s27 + $0x70] sm:$0xff]  }
  0xc2   : > { %v4281_v28 = vsel %vm4219_vm6, %v4271_v61, %v4280_v18 }
  0xc4   : > { %5931 = vmatmul.mubr.msk.bf16.gmra.mrb[16].mxu1 %vm429_vm1, %v1549_v60  ;;  %6095 = vmatmul.mubr.msk.bf16.gmra.mrb[28].mxu0 %vm429_vm1, %v3740_v8  ;;  %v1561_v60 = vsel %vm1528_vm5, %v1558_v37, %v1560_v50  ;;  %v4272_v8 = vsel %vm4219_vm6, %v4262_v40, %v4271_v61  ;;  %v2045_v37 = vrot.slane %v6802_v27, 1  ;;  %v4312_v50 = vrot.slane %v4310_v41, 2 }
  0xc5   : > { %5934 = vmatprep.mubr.msk.bf16.mxu1 %vm429_vm1, %v1551_v1  ;;  %6098 = vmatprep.mubr.msk.bf16.mxu0 %vm429_vm1, %v3742_v14  ;;  %v4283_v1 = vshrl.u32 %v6796_v59, 16  ;;  %v6809_v59 = vld [vmem:[%s6944_s27 + $0x78] sm:$0xff]   ;;  %v4331_v61 = vshll.u32 %v6807_v53, 16 }
  0xc6   : > { %v2046_v45 = vsel %vm1528_vm5, %v2043_v31, %v2045_v37 }
  0xc7   : > { %v4285_v14 = vrot.slane %v4283_v1, 2  ;;  %v4340_v1 = vshll.u32 %v6809_v59, 16 }
  0xc9   : > { %v4289_v23 = vor.u32 %v4288_v15, %v4285_v14  ;;  %v4342_v13 = vrot.slane %v4340_v1, 3  ;;  %v2053_v14 = vrot.slane %v6810_v2, 1  ;;  %v6813_v15 = vld [vmem:[%s6944_s27 + $0x88] sm:$0xff]   ;;  %v6821_v2 = vld [vmem:[%s6944_s27 + $0x10] sm:$0xf8]  }
  0xca   : > { %v4355_v22 = vshrl.u32 %v6813_v15, 16 }
  0xcb   : > { %v4290_v33 = vsel %vm4219_vm6, %v4280_v18, %v4289_v23  ;;  %v4349_v18 = vshll.u32 %v6811_v9, 16  ;;  %v6825_v9 = vld [vmem:[%s6944_s27 + $0x78] sm:$0xff]  }
  0xcc   : > { %5935 = vmatmul.mubr.msk.bf16.gmra.mrb[20].mxu1 %vm429_vm1, %v1553_v19  ;;  %6099 = vmatmul.mubr.msk.bf16.gmra.mrb[32].mxu0 %vm429_vm1, %v3744_v29  ;;  %v1565_v19 = vsel %vm1528_vm5, %v1562_v58, %v1564_v11  ;;  %v4294_v29 = vrot.slane %v4292_v20, 2  ;;  %v2049_v58 = vrot.slane %v6806_v48, 1  ;;  %v4357_v31 = vrot.slane %v4355_v22, 2  ;;  %v6829_v22 = vld [vmem:[%s6944_s27 + $0x88] sm:$0xff]  }
  0xcd   : > { %5938 = vmatprep.mubr.msk.bf16.mxu1 %vm429_vm1, %v1555_v24  ;;  %6104 = vmatprep.mubr.msk.bf16.mxu0 %vm429_vm1, %v4236_v34  ;;  %v2042_v24 = vsel %vm1528_vm5, %v2040_v12, %v2041_v16  ;;  %v4303_v34 = vrot.slane %v4301_v25, 2  ;;  %v4351_v27 = vrot.slane %v4349_v18, 3  ;;  %v6826_v18 = vld [vmem:[%s6944_s27 + $0x28] sm:$0xff]  }
  0xce   : > { %v4298_v7 = vor.u32 %v4297_v30, %v4294_v29  ;;  %v6815_v29 = vld [vmem:[%s6944_s27 + $0x90] sm:$0xff]  }
  0xcf   : > { %v4307_v44 = vor.u32 %v4306_v35, %v4303_v34  ;;  %v6817_v34 = vld [vmem:[%s6944_s27 + $0x98] sm:$0xff]   ;;  %v4352_v35 = vor.u32 %v4351_v27, %v4348_v26  ;;  %v6835_v26 = vld [vmem:[%s6944_s27 + $0x60] sm:$0xff]  }
  0xd0   : > { %v4299_v49 = vsel %vm4219_vm6, %v4289_v23, %v4298_v7  ;;  %v4358_v23 = vshll.u32 %v6813_v15, 16 }
  0xd1   : > { %v4308_v54 = vsel %vm4219_vm6, %v4298_v7, %v4307_v44  ;;  %v4367_v7 = vshll.u32 %v6815_v29, 16 }
  0xd3   : > { %v4369_v48 = vrot.slane %v4367_v7, 3  ;;  %v6837_v7 = vld [vmem:[%s6944_s27 + $0x68] sm:$0xff]  }
  0xd4   : > { %5939 = vmatmul.mubr.msk.bf16.gmra.mrb[24].mxu1 %vm429_vm1, %v1557_v42  ;;  %6105 = vmatmul.mubr.msk.bf16.vlgmr.msra.gmra.mrb[0].mxu0 %vm429_vm1, %v4245_v52  ;;  %v4313_v42 = vshll.u32 %v6803_v32, 16  ;;  %v2047_v52 = vrot.slane %v6804_v43, 1  ;;  %v4360_v32 = vrot.slane %v4358_v23, 3  ;;  %v4373_v43 = vshrl.u32 %v6817_v34, 16 }
  0xd5   : > { %5942 = vmatprep.mubr.msk.bf16.mxu1 %vm429_vm1, %v1559_v46  ;;  %6141 = vmatpush3.bf16.msra.mxu0 %v4957_v55  ;;  %v4319_v46 = vshrl.u32 %v6805_v39, 16  ;;  %v4364_v39 = vshrl.u32 %v6815_v29, 16  ;;  %v4870_v23 = vrot.slane %v6826_v18, 3  ;;  %v2071_v29 = vrot.slane %v6829_v22, 1 }
  0xd6   : > { %6108 = vmatprep.mubr.msk.bf16.mxu0 %vm429_vm1, %v4254_v56  ;;  %v4315_v51 = vrot.slane %v4313_v42, 3  ;;  %v4324_v56 = vrot.slane %v4322_v47, 3  ;;  %v2050_v0 = vsel %vm1528_vm5, %v2047_v52, %v2049_v58  ;;  %v4361_v41 = vor.u32 %v4360_v32, %v4357_v31  ;;  %v6830_v31 = vld [vmem:[%s6944_s27 + $0x38] sm:$0xff]  }
  0xd7   : > { %v4321_v55 = vrot.slane %v4319_v46, 2  ;;  %v4366_v47 = vrot.slane %v4364_v39, 2  ;;  %v6833_v39 = vld [vmem:[%s6944_s27 + $0x98] ss:$0 sps:$4 sm:$0x11]  }
  0xd8   : > { %v4316_v40 = vor.u32 %v4315_v51, %v4312_v50  ;;  %v6819_v50 = vld [vmem:[%s6944_s27 + $0xa0] ss:$0 sps:$4 sm:$0x77]   ;;  %v4362_v51 = vsel %vm4219_vm6, %v4352_v35, %v4361_v41 }
  0xd9   : > { %v4325_v63 = vor.u32 %v4324_v56, %v4321_v55  ;;  %v4370_v55 = vor.u32 %v4369_v48, %v4366_v47  ;;  %v2075_v47 = vrot.slane %v6833_v39, 1  ;;  %v2660_v48 = vshrl.u32 %v6837_v7, 16 }
  0xda   : > { %v4317_v3 = vsel %vm4219_vm6, %v4307_v44, %v4316_v40  ;;  %v4376_v44 = vshll.u32 %v6817_v34, 16  ;;  %v2654_v34 = vshll.u32 %v6835_v26, 16 }
  0xdb   : > { %v4326_v10 = vsel %vm4219_vm6, %v4316_v40, %v4325_v63  ;;  %v6820_v40 = vld [vmem:[%s6944_s27 + $0x68] sm:$0xff]  }
  0xdc   : > { %5943 = vmatmul.mubr.msk.bf16.gmra.mrb[28].mxu1 %vm429_vm1, %v1561_v60  ;;  %6109 = vmatmul.mubr.msk.bf16.gmra.mrb[4].mxu0 %vm429_vm1, %v4263_v6  ;;  %v4328_v60 = vshrl.u32 %v6807_v53, 16  ;;  %v4333_v6 = vrot.slane %v4331_v61, 3  ;;  %v4378_v53 = vrot.slane %v4376_v44, 3  ;;  %v6823_v61 = vld [vmem:[%s6944_s27 + $0x70] sm:$0xff]  }
  0xdd   : > { %5946 = vmatprep.mubr.msk.bf16.mxu1 %vm429_vm1, %v1563_v38  ;;  %6112 = vmatprep.mubr.msk.bf16.mxu0 %vm429_vm1, %v4272_v8  ;;  %v4337_v38 = vshrl.u32 %v6809_v59, 16  ;;  %v2051_v8 = vrot.slane %v6808_v62, 1  ;;  %v4385_v59 = vshll.u32 %v6819_v50, 16  ;;  %v4371_v62 = vsel %vm4219_vm6, %v4361_v41, %v4370_v55  ;;  %v6839_v44 = vld [vmem:[%s6944_s27 + $0x70] sm:$0xff]  }
  0xde   : > { %v4330_v5 = vrot.slane %v4328_v60, 2 }
  0xdf   : > { %v4339_v11 = vrot.slane %v4337_v38, 2  ;;  %v2052_v16 = vsel %vm1528_vm5, %v2049_v58, %v2051_v8  ;;  %v2054_v21 = vsel %vm1528_vm5, %v2051_v8, %v2053_v14  ;;  %v4382_v58 = vshrl.u32 %v6819_v50, 16 }
  0xe0   : > { %v4334_v12 = vor.u32 %v4333_v6, %v4330_v5  ;;  %v2063_v38 = vrot.slane %v6820_v40, 1  ;;  %v2065_v5 = vrot.slane %v6823_v61, 1  ;;  %v6841_v40 = vld [vmem:[%s6944_s27 + $0x78] sm:$0xff]  }
  0xe1   : > { %v4343_v20 = vor.u32 %v4342_v13, %v4339_v11 }
  0xe2   : > { %v4335_v25 = vsel %vm4219_vm6, %v4325_v63, %v4334_v12  ;;  %v4384_v63 = vrot.slane %v4382_v58, 2  ;;  %v2066_v13 = vsel %vm1528_vm5, %v2063_v38, %v2065_v5  ;;  %v2662_v58 = vrot.slane %v2660_v48, 1 }
  0xe3   : > { %v4344_v30 = vsel %vm4219_vm6, %v4334_v12, %v4343_v20  ;;  %v4353_v46 = vsel %vm4219_vm6, %v4343_v20, %v4352_v35  ;;  %v6824_v12 = vld [vmem:[%s6944_s27 + $0x20] sm:$0xff]  }
  0xe4   : > { %5947 = vmatmul.mubr.msk.bf16.gmra.mrb[32].mxu1 %vm429_vm1, %v1565_v19  ;;  %6113 = vmatmul.mubr.msk.bf16.gmra.mrb[8].mxu0 %vm429_vm1, %v4281_v28  ;;  %v6812_v19 = vld [vmem:[%s6944_s27 + $0x48] sm:$0xff]   ;;  %v4868_v20 = vrot.slane %v6824_v12, 3 }
  0xe5   : > { %5952 = vmatprep.mubr.msk.bf16.mxu1 %vm429_vm1, %v2042_v24  ;;  %6116 = vmatprep.mubr.msk.bf16.mxu0 %vm429_vm1, %v4290_v33  ;;  %v6814_v24 = vld [vmem:[%s6944_s27 + $0x50] sm:$0xff]   ;;  %v2055_v28 = vrot.slane %v6812_v19, 1 }
  0xe6   : > { %v2057_v33 = vrot.slane %v6814_v24, 1 }
  0xe8   : > { %v2058_v42 = vsel %vm1528_vm5, %v2055_v28, %v2057_v33 }
  0xec   : > { %5953 = vmatmul.mubr.msk.bf16.vlgmr.msra.gmra.mrb[0].mxu1 %vm429_vm1, %v2044_v57  ;;  %6117 = vmatmul.mubr.msk.bf16.gmra.mrb[12].mxu0 %vm429_vm1, %v4299_v49  ;;  %v6816_v57 = vld [vmem:[%s6944_s27 + $0x58] sm:$0xff]  }
  0xed   : > { %6179 = vmatpush3.bf16.msra.mxu1 %v6932_v4  ;;  %5956 = vmatprep.mubr.msk.bf16.mxu1 %vm429_vm1, %v2046_v45  ;;  %v2048_v4 = vsel %vm1528_vm5, %v2045_v37, %v2047_v52  ;;  %v2056_v37 = vsel %vm1528_vm5, %v2053_v14, %v2055_v28  ;;  %v6818_v45 = vld [vmem:[%s6944_s27 + $0x60] sm:$0xff]   ;;  %v2059_v49 = vrot.slane %v6816_v57, 1  ;;  %v4375_v52 = vrot.slane %v4373_v43, 2  ;;  %v6828_v28 = vld [vmem:[%s6944_s27 + $0x30] sm:$0xff]  }
  0xee   : > { %6120 = vmatprep.mubr.msk.bf16.mxu0 %vm429_vm1, %v4308_v54  ;;  %v2061_v54 = vrot.slane %v6818_v45, 1  ;;  %v6827_v14 = vld [vmem:[%s6944_s27 + $0x80] sm:$0xff]   ;;  %v4872_v35 = vrot.slane %v6828_v28, 3  ;;  %v4874_v57 = vrot.slane %v6830_v31, 3  ;;  %v2656_v43 = vrot.slane %v2654_v34, 2 }
  0xef   : > { %v2060_v56 = vsel %vm1528_vm5, %v2057_v33, %v2059_v49  ;;  %v2069_v19 = vrot.slane %v6827_v14, 1  ;;  %v2651_v33 = vshrl.u32 %v6835_v26, 16  ;;  %v6842_v26 = vld [vmem:[%s6944_s27 + $0x68] sm:$0xff]   ;;  %v6849_v34 = vld [vmem:[%s6944_s27 + $0x98] ss:$0 sps:$4 sm:$0x33]  }
  0xf0   : > { %v2062_v60 = vsel %vm1528_vm5, %v2059_v49, %v2061_v54  ;;  %v2064_v8 = vsel %vm1528_vm5, %v2061_v54, %v2063_v38  ;;  %v4873_v45 = vsel %vm4864_vm7, %v4870_v23, %v4872_v35  ;;  %v2663_v49 = vshll.u32 %v6837_v7, 16  ;;  %v6836_v38 = vld [vmem:[%s6944_s27 + $0x50] sm:$0xff]  }
  0xf1   : > { %v4875_v50 = vsel %vm4864_vm7, %v4872_v35, %v4874_v57  ;;  %v2672_v54 = vshll.u32 %v6839_v44, 16  ;;  %v4886_v35 = vrot.slane %v6842_v26, 3 }
  0xf4   : > { %5957 = vmatmul.mubr.msk.bf16.gmra.mrb[4].mxu1 %vm429_vm1, %v2048_v4  ;;  %6121 = vmatmul.mubr.msk.bf16.gmra.mrb[16].mxu0 %vm429_vm1, %v4317_v3  ;;  %v4379_v4 = vor.u32 %v4378_v53, %v4375_v52  ;;  %v6822_v3 = vld [vmem:[%s6944_s27 + $0x18] sm:$0xff]   ;;  %v2669_v53 = vshrl.u32 %v6839_v44, 16  ;;  %v2717_v44 = vshll.u32 %v6849_v34, 16 }
  0xf5   : > { %5960 = vmatprep.mubr.msk.bf16.mxu1 %vm429_vm1, %v2050_v0  ;;  %6124 = vmatprep.mubr.msk.bf16.mxu0 %vm429_vm1, %v4326_v10  ;;  %v4387_v0 = vrot.slane %v4385_v59, 3  ;;  %v4865_v10 = vrot.slane %v6821_v2, 3  ;;  %v4866_v11 = vrot.slane %v6822_v3, 3  ;;  %v2665_v59 = vrot.slane %v2663_v49, 2 }
  0xf6   : > { %v4380_v1 = vsel %vm4219_vm6, %v4370_v55, %v4379_v4  ;;  %v2671_v61 = vrot.slane %v2669_v53, 1  ;;  %v2678_v2 = vshrl.u32 %v6841_v40, 16  ;;  %v2681_v3 = vshll.u32 %v6841_v40, 16 }
  0xf7   : > { %v4388_v6 = vor.u32 %v4387_v0, %v4384_v63  ;;  %v4867_v17 = vsel %vm4864_vm7, %v4865_v10, %v4866_v11  ;;  %v4869_v27 = vsel %vm4864_vm7, %v4866_v11, %v4868_v20  ;;  %v6843_v63 = vld [vmem:[%s6944_s27 + $0x80] sm:$0xff]   ;;  %v4880_v10 = vrot.slane %v6836_v38, 3 }
  0xf8   : > { %v2683_v14 = vrot.slane %v2681_v3, 2  ;;  %v6853_v3 = vld [vmem:[%s6944_s27 + $0xa0] ss:$0 sps:$4 sm:$0x77]  }
  0xf9   : > { %v4389_v15 = vsel %vm4219_vm6, %v4379_v4, %v4388_v6  ;;  %v6838_v6 = vld [vmem:[%s6944_s27 + $0x58] sm:$0xff]  }
  0xfa   : > { %v4882_v12 = vrot.slane %v6838_v6, 3  ;;  %v4900_v6 = vrot.slane %v6853_v3, 3 }
  0xfc   : > { %5961 = vmatmul.mubr.msk.bf16.gmra.mrb[8].mxu1 %vm429_vm1, %v2052_v16  ;;  %6125 = vmatmul.mubr.msk.bf16.gmra.mrb[20].mxu0 %vm429_vm1, %v4335_v25  ;;  %v2067_v16 = vrot.slane %v6825_v9, 1  ;;  %v6831_v25 = vld [vmem:[%s6944_s27 + $0x90] sm:$0xff]   ;;  %v2690_v9 = vshll.u32 %v6843_v63, 16 }
  0xfd   : > { %5964 = vmatprep.mubr.msk.bf16.mxu1 %vm429_vm1, %v2054_v21  ;;  %6128 = vmatprep.mubr.msk.bf16.mxu0 %vm429_vm1, %v4344_v30  ;;  %v4871_v30 = vsel %vm4864_vm7, %v4868_v20, %v4870_v23  ;;  %v2073_v32 = vrot.slane %v6831_v25, 1  ;;  %v4883_v25 = vsel %vm4864_vm7, %v4880_v10, %v4882_v12 }
  0xfe   : > { %v2068_v21 = vsel %vm1528_vm5, %v2065_v5, %v2067_v16  ;;  %v2070_v24 = vsel %vm1528_vm5, %v2067_v16, %v2069_v19  ;;  %v2692_v18 = vrot.slane %v2690_v9, 2 }
  0xff   : > { %v2074_v41 = vsel %vm1528_vm5, %v2071_v29, %v2073_v32 }
 0x104   : > { %5965 = vmatmul.mubr.msk.bf16.gmra.mrb[12].mxu1 %vm429_vm1, %v2056_v37  ;;  %6129 = vmatmul.mubr.msk.bf16.gmra.mrb[24].mxu0 %vm429_vm1, %v4353_v46  ;;  %v2072_v37 = vsel %vm1528_vm5, %v2069_v19, %v2071_v29  ;;  %v6832_v46 = vld [vmem:[%s6944_s27 + $0x40] sm:$0xff]   ;;  %v6847_v19 = vld [vmem:[%s6944_s27 + $0x90] sm:$0xff]  }
 0x105   : > { %5968 = vmatprep.mubr.msk.bf16.mxu1 %vm429_vm1, %v2058_v42  ;;  %6132 = vmatprep.mubr.msk.bf16.mxu0 %vm429_vm1, %v4362_v51  ;;  %v2653_v42 = vrot.slane %v2651_v33, 1  ;;  %v6834_v51 = vld [vmem:[%s6944_s27 + $0x48] sm:$0xff]   ;;  %v4876_v55 = vrot.slane %v6832_v46, 3  ;;  %v2705_v28 = vshrl.u32 %v6847_v19, 16  ;;  %v2708_v29 = vshll.u32 %v6847_v19, 16  ;;  %v6846_v46 = vld [vmem:[%s6944_s27 + $0x78] sm:$0xff]  }
 0x106   : > { %v4878_v4 = vrot.slane %v6834_v51, 3  ;;  %v2719_v51 = vrot.slane %v2717_v44, 2 }
 0x107   : > { %v2657_v52 = vor.u32 %v2656_v43, %v2653_v42  ;;  %v4877_v0 = vsel %vm4864_vm7, %v4874_v57, %v4876_v55  ;;  %v2707_v39 = vrot.slane %v2705_v28, 1  ;;  %v2710_v7 = vrot.slane %v2708_v29, 2  ;;  %v7496_v28 = vld [vmem:[%s7593_s2] ss:$0 sm:$0xff] }
 0x108   : > { %v4879_v5 = vsel %vm4864_vm7, %v4876_v55, %v4878_v4  ;;  %v4881_v20 = vsel %vm4864_vm7, %v4878_v4, %v4880_v10  ;;  %v2714_v43 = vshrl.u32 %v6849_v34, 16  ;;  %v6848_v55 = vld [vmem:[%s6944_s27 + $0x80] sm:$0xff]  }
 0x109   : > { %v4892_v40 = vrot.slane %v6848_v55, 3 }
 0x10c   : > { %5969 = vmatmul.mubr.msk.bf16.gmra.mrb[16].mxu1 %vm429_vm1, %v2060_v56  ;;  %6133 = vmatmul.mubr.msk.bf16.gmra.mrb[28].mxu0 %vm429_vm1, %v4371_v62  ;;  %v2076_v56 = vsel %vm1528_vm5, %v2073_v32, %v2075_v47  ;;  %v2674_v62 = vrot.slane %v2672_v54, 2  ;;  %v2711_v47 = vor.u32 %v2710_v7, %v2707_v39 }
 0x10d   : > { %5972 = vmatprep.mubr.msk.bf16.mxu1 %vm429_vm1, %v2062_v60  ;;  %6136 = vmatprep.mubr.msk.bf16.mxu0 %vm429_vm1, %v4380_v1  ;;  %v2658_v60 = vsel %vm2551_vm2, %v7016_v36, %v2657_v52  ;;  %v2666_v1 = vor.u32 %v2665_v59, %v2662_v58  ;;  %v2687_v36 = vshrl.u32 %v6843_v63, 16  ;;  %v6850_v59 = vld [vmem:[%s6944_s27 + $0x88] sm:$0xff]  }
 0x10f   : > { %v2667_v11 = vsel %vm2551_vm2, %v2657_v52, %v2666_v1  ;;  %v4890_v52 = vrot.slane %v6846_v46, 3 }
 0x114   : > { %5973 = vmatmul.mubr.msk.bf16.gmra.mrb[20].mxu1 %vm429_vm1, %v2064_v8  ;;  %6137 = vmatmul.mubr.msk.bf16.gmra.mrb[32].mxu0 %vm429_vm1, %v4389_v15  ;;  %v2675_v8 = vor.u32 %v2674_v62, %v2671_v61  ;;  %v6845_v15 = vld [vmem:[%s6944_s27 + $0x88] sm:$0xff]   ;;  %v4893_v61 = vsel %vm4864_vm7, %v4890_v52, %v4892_v40  ;;  %v6851_v62 = vld [vmem:[%s6944_s27 + $0x90] sm:$0xff]  }
 0x115   : > { %5976 = vmatprep.mubr.msk.bf16.mxu1 %vm429_vm1, %v2066_v13  ;;  %6142 = vmatprep.mubr.msk.bf16.mxu0 %vm429_vm1, %v4867_v17  ;;  %v2680_v13 = vrot.slane %v2678_v2, 1  ;;  %v2689_v17 = vrot.slane %v2687_v36, 1  ;;  %v2696_v23 = vshrl.u32 %v6845_v15, 16  ;;  %v4896_v38 = vrot.slane %v6851_v62, 3 }
 0x116   : > { %v2676_v16 = vsel %vm2551_vm2, %v2666_v1, %v2675_v8 }
 0x117   : > { %v2684_v22 = vor.u32 %v2683_v14, %v2680_v13  ;;  %v2698_v32 = vrot.slane %v2696_v23, 1 }
 0x119   : > { %v2685_v31 = vsel %vm2551_vm2, %v2675_v8, %v2684_v22 }
 0x11c   : > { %5977 = vmatmul.mubr.msk.bf16.gmra.mrb[24].mxu1 %vm429_vm1, %v2068_v21  ;;  %6143 = vmatmul.mubr.msk.bf16.vlgmr.msra.gmra.mrb[0].mxu0 %vm429_vm1, %v4869_v27  ;;  %v6840_v21 = vld [vmem:[%s6944_s27 + $0x60] sm:$0xff]   ;;  %v2693_v27 = vor.u32 %v2692_v18, %v2689_v17 }
 0x11d   : > { %5980 = vmatprep.mubr.msk.bf16.mxu1 %vm429_vm1, %v2070_v24  ;;  %6146 = vmatprep.mubr.msk.bf16.mxu0 %vm429_vm1, %v4871_v30  ;;  %v2699_v24 = vshll.u32 %v6845_v15, 16  ;;  %v4884_v30 = vrot.slane %v6840_v21, 3 }
 0x11f   : > { %v2701_v33 = vrot.slane %v2699_v24, 2  ;;  %v4885_v57 = vsel %vm4864_vm7, %v4882_v12, %v4884_v30 }
 0x121   : > { %v2702_v42 = vor.u32 %v2701_v33, %v2698_v32 }
 0x123   : > { %v2703_v49 = vsel %vm2551_vm2, %v2693_v27, %v2702_v42  ;;  %v2712_v53 = vsel %vm2551_vm2, %v2702_v42, %v2711_v47 }
 0x124   : > { %5981 = vmatmul.mubr.msk.bf16.gmra.mrb[28].mxu1 %vm429_vm1, %v2072_v37  ;;  %6147 = vmatmul.mubr.msk.bf16.gmra.mrb[4].mxu0 %vm429_vm1, %v4873_v45  ;;  %v2694_v37 = vsel %vm2551_vm2, %v2684_v22, %v2693_v27  ;;  %v4887_v45 = vsel %vm4864_vm7, %v4884_v30, %v4886_v35 }
 0x125   : > { %5984 = vmatprep.mubr.msk.bf16.mxu1 %vm429_vm1, %v2074_v41  ;;  %6150 = vmatprep.mubr.msk.bf16.mxu0 %vm429_vm1, %v4875_v50  ;;  %v6844_v41 = vld [vmem:[%s6944_s27 + $0x70] sm:$0xff]   ;;  %v2716_v50 = vrot.slane %v2714_v43, 1 }
 0x126   : > { %v4888_v48 = vrot.slane %v6844_v41, 3 }
 0x128   : > { %v4889_v54 = vsel %vm4864_vm7, %v4886_v35, %v4888_v48  ;;  %v4891_v58 = vsel %vm4864_vm7, %v4888_v48, %v4890_v52 }
 0x12c   : > { %5985 = vmatmul.mubr.msk.bf16.gmra.mrb[32].mxu1 %vm429_vm1, %v2076_v56  ;;  %6151 = vmatmul.mubr.msk.bf16.gmra.mrb[8].mxu0 %vm429_vm1, %v4877_v0  ;;  %v2720_v56 = vor.u32 %v2719_v51, %v2716_v50  ;;  %v6852_v0 = vld [vmem:[%s6944_s27 + $0x98] sm:$0xff]  }
 0x12d   : > { %6010 = vmatprep.mubr.msk.bf16.mxu1 %vm429_vm1, %v2658_v60  ;;  %6154 = vmatprep.mubr.msk.bf16.mxu0 %vm429_vm1, %v4879_v5  ;;  %v4894_v60 = vrot.slane %v6850_v59, 3  ;;  %v4898_v1 = vrot.slane %v6852_v0, 3 }
 0x12e   : > { %v2721_v4 = vsel %vm2551_vm2, %v2711_v47, %v2720_v56 }
 0x12f   : > { %v4895_v63 = vsel %vm4864_vm7, %v4892_v40, %v4894_v60  ;;  %v4897_v2 = vsel %vm4864_vm7, %v4894_v60, %v4896_v38  ;;  %v4899_v5 = vsel %vm4864_vm7, %v4896_v38, %v4898_v1  ;;  %v4901_v8 = vsel %vm4864_vm7, %v4898_v1, %v4900_v6 }
 0x134   : > { %6011 = vmatmul.mubr.msk.bf16.vlgmr.msra.gmra.mrb[20].mxu1 %vm429_vm1, %v2667_v11  ;;  %6155 = vmatmul.mubr.msk.bf16.gmra.mrb[12].mxu0 %vm429_vm1, %v4881_v20 }
 0x135   : > { %6014 = vmatprep.mubr.msk.bf16.mxu1 %vm429_vm1, %v2676_v16  ;;  %6158 = vmatprep.mubr.msk.bf16.mxu0 %vm429_vm1, %v4883_v25 }
 0x13c   : > { %6015 = vmatmul.mubr.msk.bf16.gmra.mrb[24].mxu1 %vm429_vm1, %v2685_v31  ;;  %6159 = vmatmul.mubr.msk.bf16.gmra.mrb[16].mxu0 %vm429_vm1, %v4885_v57 }
 0x13d   : > { %6018 = vmatprep.mubr.msk.bf16.mxu1 %vm429_vm1, %v2694_v37  ;;  %6162 = vmatprep.mubr.msk.bf16.mxu0 %vm429_vm1, %v4887_v45 }
 0x144   : > { %6019 = vmatmul.mubr.msk.bf16.gmra.mrb[28].mxu1 %vm429_vm1, %v2703_v49  ;;  %6163 = vmatmul.mubr.msk.bf16.gmra.mrb[20].mxu0 %vm429_vm1, %v4889_v54 }
 0x145   : > { %6022 = vmatprep.mubr.msk.bf16.mxu1 %vm429_vm1, %v2712_v53  ;;  %6166 = vmatprep.mubr.msk.bf16.mxu0 %vm429_vm1, %v4891_v58 }
 0x14c   : > { %6023 = vmatmul.mubr.msk.bf16.gmra.mrb[32].mxu1 %vm429_vm1, %v2721_v4  ;;  %6167 = vmatmul.mubr.msk.bf16.gmra.mrb[24].mxu0 %vm429_vm1, %v4893_v61 }
 0x14d   : > { %6170 = vmatprep.mubr.msk.bf16.mxu0 %vm429_vm1, %v4895_v63 }
 0x154   : > { %6171 = vmatmul.mubr.msk.bf16.gmra.mrb[28].mxu0 %vm429_vm1, %v4897_v2 }
 0x155   : > { %6174 = vmatprep.mubr.msk.bf16.mxu0 %vm429_vm1, %v4899_v5 }
 0x15c   : > { %6175 = vmatmul.mubr.msk.bf16.gmra.mrb[32].mxu0 %vm429_vm1, %v4901_v8 }
 0x1bf   : > { %v5954_v36 = vpop.f32.mrb[0].mxu1 }
 0x1c0   : > { %v2168_v9 = vpop.f32.mrb[1].mxu1  ;;  %v6182_v29 = vadd.f32 %v5954_v36, %v7496_v28 }
 0x1c1   : > { %v5955_v10 = vpop.f32.mrb[2].mxu1  ;;  %v6188_v30 = vadd.f32 %v7496_v28, %v2168_v9 }
 0x1c2   : > { %v2171_v11 = vpop.f32.mrb[3].mxu1  ;;  %v6194_v32 = vadd.f32 %v5955_v10, %v7496_v28 }
 0x1c3   : > { %v6200_v35 = vadd.f32 %v7496_v28, %v2171_v11 }
 0x1c7   : > { %v5958_v13 = vpop.f32.mrb[4].mxu1 }
 0x1c8   : > { %v2184_v14 = vpop.f32.mrb[5].mxu1  ;;  %v6206_v42 = vadd.f32 %v5958_v13, %v7496_v28 }
 0x1c9   : > { %v5959_v15 = vpop.f32.mrb[6].mxu1  ;;  %v6212_v43 = vadd.f32 %v7496_v28, %v2184_v14 }
 0x1ca   : > { %v2187_v12 = vpop.f32.mrb[7].mxu1  ;;  %v6218_v45 = vadd.f32 %v5959_v15, %v7496_v28 }
 0x1cb   : > { %v6224_v48 = vadd.f32 %v7496_v28, %v2187_v12 }
 0x1cf   : > { %v5962_v16 = vpop.f32.mrb[8].mxu1 }
 0x1d0   : > { %v2200_v17 = vpop.f32.mrb[9].mxu1  ;;  %v6230_v54 = vadd.f32 %v5962_v16, %v7496_v28 }
 0x1d1   : > { %v5963_v18 = vpop.f32.mrb[10].mxu1  ;;  %v6236_v55 = vadd.f32 %v7496_v28, %v2200_v17 }
 0x1d2   : > { %v2203_v19 = vpop.f32.mrb[11].mxu1  ;;  %v6242_v58 = vadd.f32 %v5963_v18, %v7496_v28 }
 0x1d3   : > { %v6248_v4 = vadd.f32 %v7496_v28, %v2203_v19 }
 0x1d7   : > { %v5966_v20 = vpop.f32.mrb[12].mxu1 }
 0x1d8   : > { %v7478_v21 = vpop.f32.mrb[13].mxu1  ;;  %v6254_v3 = vadd.f32 %v5966_v20, %v7496_v28 }
 0x1d9   : > { %v7480_v22 = vpop.f32.mrb[14].mxu1  ;;  %v6260_v6 = vadd.f32 %v7496_v28, %v7478_v21 }
 0x1da   : > { %v7482_v23 = vpop.f32.mrb[15].mxu1  ;;  %v6266_v36 = vadd.f32 %v7480_v22, %v7496_v28 }
 0x1db   : > { %v6272_v11 = vadd.f32 %v7496_v28, %v7482_v23 }
 0x1df   : > { %v7484_v24 = vpop.f32.mrb[16].mxu1 }
 0x1e0   : > { %v7486_v25 = vpop.f32.mrb[17].mxu1  ;;  %v6278_v20 = vadd.f32 %v7484_v24, %v7496_v28 }
 0x1e1   : > { %v7488_v26 = vpop.f32.mrb[18].mxu1  ;;  %v6284_v22 = vadd.f32 %v7496_v28, %v7486_v25 }
 0x1e2   : > { %v7490_v27 = vpop.f32.mrb[19].mxu1 }
 0x1ef   : > { %v6144_v31 = vpop.f32.mrb[0].mxu0 }
 0x1f0   : > { %v6185_v33 = vadd.f32 %v6182_v29, %v6144_v31  ;;  %v4993_v34 = vpop.f32.mrb[1].mxu0  ;;  %v6290_v29 = vadd.f32 %v7488_v26, %v7496_v28 }
 0x1f1   : > { %v6191_v37 = vadd.f32 %v6188_v30, %v4993_v34  ;;  %v6145_v39 = vpop.f32.mrb[2].mxu0 }
 0x1f2   : > { %5174 = vst [vmem:[%s7502_s22 + $0x10] sm:$0xff] %v6185_v33  ;;  %v6197_v7 = vadd.f32 %v6194_v32, %v6145_v39  ;;  %v4996_v57 = vpop.f32.mrb[3].mxu0  ;;  %v6296_v32 = vadd.f32 %v7496_v28, %v7490_v27 }
 0x1f3   : > { %5172 = vst [vmem:[%s7502_s22] sm:$0xff] %v6191_v37  ;;  %v6203_v41 = vadd.f32 %v6200_v35, %v4996_v57 }
 0x1f4   : > { %5175 = vst [vmem:[%s7502_s22 + $0x18] sm:$0xff] %v6197_v7 }
 0x1f5   : > { %5173 = vst [vmem:[%s7502_s22 + $0x8] sm:$0xff] %v6203_v41 }
 0x1f7   : > { %v6148_v44 = vpop.f32.mrb[4].mxu0 }
 0x1f8   : > { %v6209_v46 = vadd.f32 %v6206_v42, %v6148_v44  ;;  %v5009_v47 = vpop.f32.mrb[5].mxu0 }
 0x1f9   : > { %v6215_v49 = vadd.f32 %v6212_v43, %v5009_v47  ;;  %v6149_v50 = vpop.f32.mrb[6].mxu0 }
 0x1fa   : > { %5178 = vst [vmem:[%s7502_s22 + $0x30] sm:$0xff] %v6209_v46  ;;  %v6221_v51 = vadd.f32 %v6218_v45, %v6149_v50  ;;  %v5012_v52 = vpop.f32.mrb[7].mxu0 }
 0x1fb   : > { %5176 = vst [vmem:[%s7502_s22 + $0x20] sm:$0xff] %v6215_v49  ;;  %v6227_v53 = vadd.f32 %v6224_v48, %v5012_v52 }
 0x1fc   : > { %5179 = vst [vmem:[%s7502_s22 + $0x38] sm:$0xff] %v6221_v51 }
 0x1fd   : > { %5177 = vst [vmem:[%s7502_s22 + $0x28] sm:$0xff] %v6227_v53 }
 0x1ff   : > { %v6152_v56 = vpop.f32.mrb[8].mxu0 }
 0x200   : > { %v6233_v59 = vadd.f32 %v6230_v54, %v6152_v56  ;;  %v5025_v40 = vpop.f32.mrb[9].mxu0 }
 0x201   : > { %v6239_v60 = vadd.f32 %v6236_v55, %v5025_v40  ;;  %v6153_v61 = vpop.f32.mrb[10].mxu0 }
 0x202   : > { %5182 = vst [vmem:[%s7502_s22 + $0x50] sm:$0xff] %v6233_v59  ;;  %v6245_v62 = vadd.f32 %v6242_v58, %v6153_v61  ;;  %v5028_v63 = vpop.f32.mrb[11].mxu0 }
 0x203   : > { %5180 = vst [vmem:[%s7502_s22 + $0x40] sm:$0xff] %v6239_v60  ;;  %v6251_v0 = vadd.f32 %v6248_v4, %v5028_v63 }
 0x204   : > { %5183 = vst [vmem:[%s7502_s22 + $0x58] sm:$0xff] %v6245_v62 }
 0x205   : > { %5181 = vst [vmem:[%s7502_s22 + $0x48] sm:$0xff] %v6251_v0 }
 0x207   : > { %v6012_v38 = vpop.f32.mrb[20].mxu1  ;;  %v6156_v8 = vpop.f32.mrb[12].mxu0 }
 0x208   : > { %v2893_v1 = vpop.f32.mrb[21].mxu1  ;;  %v6257_v9 = vadd.f32 %v6254_v3, %v6156_v8  ;;  %v5041_v10 = vpop.f32.mrb[13].mxu0  ;;  %v6302_v26 = vadd.f32 %v6012_v38, %v7496_v28 }
 0x209   : > { %v6013_v2 = vpop.f32.mrb[22].mxu1  ;;  %v6263_v13 = vadd.f32 %v6260_v6, %v5041_v10  ;;  %v6157_v14 = vpop.f32.mrb[14].mxu0  ;;  %v6308_v27 = vadd.f32 %v7496_v28, %v2893_v1 }
 0x20a   : > { %v2896_v5 = vpop.f32.mrb[23].mxu1  ;;  %5186 = vst [vmem:[%s7502_s22 + $0x70] sm:$0xff] %v6257_v9  ;;  %v6269_v15 = vadd.f32 %v6266_v36, %v6157_v14  ;;  %v5044_v12 = vpop.f32.mrb[15].mxu0  ;;  %v6314_v42 = vadd.f32 %v6013_v2, %v7496_v28 }
 0x20b   : > { %5184 = vst [vmem:[%s7502_s22 + $0x60] sm:$0xff] %v6263_v13  ;;  %v6275_v16 = vadd.f32 %v6272_v11, %v5044_v12  ;;  %v6320_v45 = vadd.f32 %v7496_v28, %v2896_v5 }
 0x20c   : > { %5187 = vst [vmem:[%s7502_s22 + $0x78] sm:$0xff] %v6269_v15 }
 0x20d   : > { %5185 = vst [vmem:[%s7502_s22 + $0x68] sm:$0xff] %v6275_v16 }
 0x20f   : > { %v6016_v17 = vpop.f32.mrb[24].mxu1  ;;  %v6160_v23 = vpop.f32.mrb[16].mxu0 }
 0x210   : > { %v2909_v18 = vpop.f32.mrb[25].mxu1  ;;  %v6281_v30 = vadd.f32 %v6278_v20, %v6160_v23  ;;  %v5057_v31 = vpop.f32.mrb[17].mxu0  ;;  %v6326_v54 = vadd.f32 %v6016_v17, %v7496_v28 }
 0x211   : > { %v6017_v19 = vpop.f32.mrb[26].mxu1  ;;  %v6287_v33 = vadd.f32 %v6284_v22, %v5057_v31  ;;  %v6161_v34 = vpop.f32.mrb[18].mxu0  ;;  %v6332_v56 = vadd.f32 %v7496_v28, %v2909_v18 }
 0x212   : > { %v2912_v21 = vpop.f32.mrb[27].mxu1  ;;  %5190 = vst [vmem:[%s7502_s22 + $0x90] sm:$0xff] %v6281_v30  ;;  %v6293_v35 = vadd.f32 %v6290_v29, %v6161_v34  ;;  %v5060_v24 = vpop.f32.mrb[19].mxu0  ;;  %v6338_v59 = vadd.f32 %v6017_v19, %v7496_v28 }
 0x213   : > { %5188 = vst [vmem:[%s7502_s22 + $0x80] sm:$0xff] %v6287_v33  ;;  %v6299_v37 = vadd.f32 %v6296_v32, %v5060_v24  ;;  %v6344_v60 = vadd.f32 %v7496_v28, %v2912_v21 }
 0x214   : > { %5191 = vst [vmem:[%s7502_s22 + $0x98] sm:$0xff] %v6293_v35 }
 0x215   : > { %5189 = vst [vmem:[%s7502_s22 + $0x88] sm:$0xff] %v6299_v37 }
 0x217   : > { %v6020_v39 = vpop.f32.mrb[28].mxu1  ;;  %v6164_v41 = vpop.f32.mrb[20].mxu0 }
 0x218   : > { %v2925_v25 = vpop.f32.mrb[29].mxu1  ;;  %v6305_v43 = vadd.f32 %v6302_v26, %v6164_v41  ;;  %v5073_v44 = vpop.f32.mrb[21].mxu0  ;;  %v6350_v1 = vadd.f32 %v6020_v39, %v7496_v28 }
 0x219   : > { %v6021_v7 = vpop.f32.mrb[30].mxu1  ;;  %v6311_v46 = vadd.f32 %v6308_v27, %v5073_v44  ;;  %v6165_v47 = vpop.f32.mrb[22].mxu0  ;;  %v6356_v2 = vadd.f32 %v7496_v28, %v2925_v25 }
 0x21a   : > { %v2928_v57 = vpop.f32.mrb[31].mxu1  ;;  %5194 = vst [vmem:[%s7502_s22 + $0xb0] sm:$0xff] %v6305_v43  ;;  %v6317_v48 = vadd.f32 %v6314_v42, %v6165_v47  ;;  %v5076_v49 = vpop.f32.mrb[23].mxu0  ;;  %v6362_v5 = vadd.f32 %v6021_v7, %v7496_v28 }
 0x21b   : > { %5192 = vst [vmem:[%s7502_s22 + $0xa0] sm:$0xff] %v6311_v46  ;;  %v6323_v50 = vadd.f32 %v6320_v45, %v5076_v49  ;;  %v6368_v36 = vadd.f32 %v7496_v28, %v2928_v57 }
 0x21c   : > { %5195 = vst [vmem:[%s7502_s22 + $0xb8] sm:$0xff] %v6317_v48 }
 0x21d   : > { %5193 = vst [vmem:[%s7502_s22 + $0xa8] sm:$0xff] %v6323_v50 }
 0x21f   : > { %v6024_v51 = vpop.f32.mrb[32].mxu1  ;;  %v6168_v58 = vpop.f32.mrb[24].mxu0 }
 0x220   : > { %v2941_v52 = vpop.f32.mrb[33].mxu1  ;;  %v6329_v40 = vadd.f32 %v6326_v54, %v6168_v58  ;;  %v5089_v4 = vpop.f32.mrb[25].mxu0  ;;  %v6374_v15 = vadd.f32 %v6024_v51, %v7496_v28 }
 0x221   : > { %v6025_v53 = vpop.f32.mrb[34].mxu1  ;;  %v6335_v61 = vadd.f32 %v6332_v56, %v5089_v4  ;;  %v6169_v62 = vpop.f32.mrb[26].mxu0  ;;  %v6380_v12 = vadd.f32 %v7496_v28, %v2941_v52 }
 0x222   : > { %v2944_v55 = vpop.f32.mrb[35].mxu1  ;;  %5198 = vst [vmem:[%s7502_s22 + $0xd0] sm:$0xff] %v6329_v40  ;;  %v6341_v63 = vadd.f32 %v6338_v59, %v6169_v62  ;;  %v5092_v0 = vpop.f32.mrb[27].mxu0  ;;  %v6386_v17 = vadd.f32 %v6025_v53, %v7496_v28 }
 0x223   : > { %5196 = vst [vmem:[%s7502_s22 + $0xc0] sm:$0xff] %v6335_v61  ;;  %v6347_v38 = vadd.f32 %v6344_v60, %v5092_v0  ;;  %v6392_v20 = vadd.f32 %v7496_v28, %v2944_v55 }
 0x224   : > { %5199 = vst [vmem:[%s7502_s22 + $0xd8] sm:$0xff] %v6341_v63 }
 0x225   : > { %5197 = vst [vmem:[%s7502_s22 + $0xc8] sm:$0xff] %v6347_v38 }
 0x227   : > { %v6172_v3 = vpop.f32.mrb[28].mxu0 }
 0x228   : > { %v6353_v6 = vadd.f32 %v6350_v1, %v6172_v3  ;;  %v5105_v8 = vpop.f32.mrb[29].mxu0 }
 0x229   : > { %v6359_v9 = vadd.f32 %v6356_v2, %v5105_v8  ;;  %v6173_v10 = vpop.f32.mrb[30].mxu0 }
 0x22a   : > { %5202 = vst [vmem:[%s7502_s22 + $0xf0] sm:$0xff] %v6353_v6  ;;  %v6365_v11 = vadd.f32 %v6362_v5, %v6173_v10  ;;  %v5108_v13 = vpop.f32.mrb[31].mxu0 }
 0x22b   : > { %5200 = vst [vmem:[%s7502_s22 + $0xe0] sm:$0xff] %v6359_v9  ;;  %v6371_v14 = vadd.f32 %v6368_v36, %v5108_v13 }
 0x22c   : > { %5203 = vst [vmem:[%s7502_s22 + $0xf8] sm:$0xff] %v6365_v11 }
 0x22d   : > { %5201 = vst [vmem:[%s7502_s22 + $0xe8] sm:$0xff] %v6371_v14 }
 0x22f   : > { %v6176_v16 = vpop.f32.mrb[32].mxu0 }
 0x230   : > { %v6377_v18 = vadd.f32 %v6374_v15, %v6176_v16  ;;  %v5121_v19 = vpop.f32.mrb[33].mxu0 }
 0x231   : > { %v6383_v21 = vadd.f32 %v6380_v12, %v5121_v19  ;;  %v6177_v22 = vpop.f32.mrb[34].mxu0 }
 0x232   : > { %5206 = vst [vmem:[%s7502_s22 + $0x110] sm:$0xff] %v6377_v18  ;;  %v6389_v23 = vadd.f32 %v6386_v17, %v6177_v22  ;;  %v5124_v29 = vpop.f32.mrb[35].mxu0 }
 0x233   : > { %5204 = vst [vmem:[%s7502_s22 + $0x100] sm:$0xff] %v6383_v21  ;;  %v6395_v30 = vadd.f32 %v6392_v20, %v5124_v29 }
 0x234   : > { %5207 = vst [vmem:[%s7502_s22 + $0x118] sm:$0xff] %v6389_v23 }
 0x235   : > { %5205 = vst [vmem:[%s7502_s22 + $0x108] sm:$0xff] %v6395_v30 }
 0x236 PF: > { %s13_s14 = sadd.s32 1, %s6877_s14   ;;  %s7595_s12 = smov %s6873_s13 }
 0x237   : > { %p10_p5 = scmp.ge.s32.totalorder %s13_s14, 4   ;;  %s7596_s13 = smov %s7598_s15 }
 0x239   :  { %12 = sbr.rel (!%p10_p5) target bundleno = 2 (0x2), region = 76 }

</bundles_post_ra>
